<compile_context>
chip_gen: v7x
topology: tpu7x:2x2x1
jax: 0.10.0
libtpu: 0.0.40
codegen_flags: <defaults>
</compile_context>

<pallas_src>
import jax
import jax.numpy as jnp
from jax.experimental import pallas as pl
from jax.experimental.pallas import tpu as pltpu


# --------------------------------------------------------------------------
# Kernel
# --------------------------------------------------------------------------
def convgru_kernel(h_ref, x_ref,
                   wh_zr_ref, wx_all_ref, wh_q_ref,
                   b_zr_ref, b_q_ref,
                   out_ref):
    H = h_ref.shape[0]

    h = h_ref[...]            # (H, tl), bf16 — MXU operand
    x = x_ref[...]            # (D, tl), bf16 — MXU operand

    # Fused x-contribution for all three gates: (3H, tl), f32 accumulation.
    xg = jnp.dot(wx_all_ref[...], x, preferred_element_type=jnp.float32)
    # Fused h-contribution for z and r: (2H, tl), f32 accumulation.
    hg = jnp.dot(wh_zr_ref[...], h, preferred_element_type=jnp.float32)

    # One sigmoid over the fused (2H, tl) z/r pre-activation (f32 math).
    zr = jax.nn.sigmoid(hg + xg[:2 * H, :]
                        + b_zr_ref[...].astype(jnp.float32))
    z = zr[:H, :]
    r = zr[H:, :]

    hf = h.astype(jnp.float32)

    # q = tanh(Wqh @ (r*h) + Wqx @ x + bq); the (r*h) dot has a true data
    # dependency on r so it cannot be fused with the other dots.
    rh = (r * hf).astype(h.dtype)     # bf16 MXU operand
    q = jnp.tanh(jnp.dot(wh_q_ref[...], rh,
                         preferred_element_type=jnp.float32)
                 + xg[2 * H:, :]
                 + b_q_ref[...].astype(jnp.float32))

    out_ref[...] = ((1.0 - z) * hf + z * q).astype(out_ref.dtype)


# --------------------------------------------------------------------------
# Tiling / VMEM budgeting helpers
# --------------------------------------------------------------------------
def _vmem_block_bytes(H, D, tl, act_bytes, out_bytes):
    """Conservative per-grid-step VMEM estimate for the kernel."""
    # Double-buffered tiled operands (h, x inputs + out).
    io = 2 * (H * tl * act_bytes + D * tl * act_bytes + H * tl * out_bytes)
    # Single-buffered resident weights (bf16) + biases (f32).
    w = (2 * H * H + 3 * H * D + H * H) * act_bytes + (3 * H) * 4
    # f32 intermediates: xg(3H) + hg(2H) + zr(2H) + {hf, rh, q, blend}(~4H).
    inter = (11 * H) * tl * 4
    return io + w + inter


def _choose_token_tile(L_pad, N, H, D, act_bytes, out_bytes,
                       tl_max=1024, vmem_budget=40 << 20):
    """Largest lane-dense (multiple-of-128) tile dividing L_pad that fits the
    VMEM budget, while keeping >= 2 grid programs for the v7x megacore."""
    assert L_pad % 128 == 0
    best = 128
    t = (min(tl_max, L_pad) // 128) * 128
    while t >= 128:
        if (L_pad % t == 0
                and _vmem_block_bytes(H, D, t, act_bytes, out_bytes) <= vmem_budget):
            best = t
            break
        t -= 128
    # Keep at least 2 grid programs so both v7x TensorCores get work.
    if N * (L_pad // best) < 2 and L_pad >= 256:
        t = ((L_pad // 2) // 128) * 128
        while t >= 128:
            if L_pad % t == 0:
                best = t
                break
            t -= 128
    return best


# --------------------------------------------------------------------------
# Wrapper
# --------------------------------------------------------------------------
def convgru_pallas(h, x, fused_params, *, tl_max=1024,
                   compute_dtype=jnp.bfloat16):
    """h: (N, H, L), x: (N, D, L) -> (N, H, L).  PyTorch NCL semantics."""
    N, H, L = h.shape
    _, D, Lx = x.shape
    assert Lx == L
    assert H % 8 == 0, "H must be a multiple of 8 for aligned sublane slices"

    wh_zr, wx_all, wh_q, b_zr, b_q = fused_params
    wh_zr = wh_zr.astype(compute_dtype)
    wx_all = wx_all.astype(compute_dtype)
    wh_q = wh_q.astype(compute_dtype)
    b_zr = b_zr.astype(jnp.float32)
    b_q = b_q.astype(jnp.float32)

    out_dtype = h.dtype
    act_bytes = jnp.dtype(compute_dtype).itemsize
    out_bytes = jnp.dtype(out_dtype).itemsize

    # Pad L to a multiple of 128 so every token tile is lane-dense (unmasked
    # vst); the padded tail is sliced off after the call.
    L_pad = ((L + 127) // 128) * 128
    if L_pad != L:
        pad = ((0, 0), (0, 0), (0, L_pad - L))
        h_in = jnp.pad(h, pad)
        x_in = jnp.pad(x, pad)
    else:
        h_in, x_in = h, x

    # bf16 MXU operands / halved HBM bytes for the activations.
    h_in = h_in.astype(compute_dtype)
    x_in = x_in.astype(compute_dtype)

    tl = _choose_token_tile(L_pad, N, H, D, act_bytes, out_bytes, tl_max)
    est = _vmem_block_bytes(H, D, tl, act_bytes, out_bytes)
    vmem_limit = int(min(max(2 * est, 32 << 20), 48 << 20))

    def tok_spec(C):
        # Squeeze the batch dim; channels on sublanes, tokens on lanes.
        return pl.BlockSpec((None, C, tl), lambda n, l: (n, 0, l))

    def w_spec(R, C):
        # Constant index map -> resident operand; single buffer is enough.
        return pl.BlockSpec((R, C), lambda n, l: (0, 0),
                            pipeline_mode=pl.Buffered(1))

    out = pl.pallas_call(
        convgru_kernel,
        out_shape=jax.ShapeDtypeStruct((N, H, L_pad), out_dtype),
        grid_spec=pltpu.PrefetchScalarGridSpec(
            num_scalar_prefetch=0,
            grid=(N, L_pad // tl),
            in_specs=[tok_spec(H), tok_spec(D),
                      w_spec(2 * H, H),      # [Wzh; Wrh]
                      w_spec(3 * H, D),      # [Wzx; Wrx; Wqx]
                      w_spec(H, H),          # Wqh
                      w_spec(2 * H, 1),      # [bz; br]
                      w_spec(H, 1)],         # bq
            out_specs=tok_spec(H),
        ),
        compiler_params=pltpu.CompilerParams(
            dimension_semantics=("parallel", "parallel"),
            vmem_limit_bytes=vmem_limit),
    )(h_in, x_in, wh_zr, wx_all, wh_q, b_zr, b_q)

    return out[:, :, :L] if L_pad != L else out


# --------------------------------------------------------------------------
# Parameter construction (PyTorch Conv1d(ksize=1) layout) and reference
# --------------------------------------------------------------------------
def make_params(key, input_dim, hidden_dim, dtype=jnp.float32):
    """Synthetic PyTorch-style Conv1d(ksize=1) weights.

    Each gate weight has shape (H, H+D): columns [0:H] act on h, [H:] on x
    (matching hx = cat([h, x], dim=1)).  Biases have shape (H,).
    """
    H, D = hidden_dim, input_dim
    keys = jax.random.split(key, 6)
    s = 0.05

    def w(k, shape):
        return (s * jax.random.normal(k, shape)).astype(dtype)

    Wz, bz = w(keys[0], (H, H + D)), w(keys[1], (H,))
    Wr, br = w(keys[2], (H, H + D)), w(keys[3], (H,))
    Wq, bq = w(keys[4], (H, H + D)), w(keys[5], (H,))
    return (Wz, bz, Wr, br, Wq, bq)


def fuse_params(raw_params, hidden_dim, compute_dtype=jnp.bfloat16):
    """Pre-concatenate gate weights for the fused-matmul kernel layout.
    Weights are cast to the MXU compute dtype once here; biases stay f32."""
    Wz, bz, Wr, br, Wq, bq = raw_params
    H = hidden_dim
    wh_zr = jnp.concatenate([Wz[:, :H], Wr[:, :H]], axis=0)              # (2H, H)
    wx_all = jnp.concatenate([Wz[:, H:], Wr[:, H:], Wq[:, H:]], axis=0)  # (3H, D)
    wh_q = Wq[:, :H]                                                     # (H, H)
    b_zr = jnp.concatenate([bz, br], axis=0)[:, None]                    # (2H, 1)
    b_q = bq[:, None]                                                    # (H, 1)
    return (wh_zr.astype(compute_dtype),
            wx_all.astype(compute_dtype),
            wh_q.astype(compute_dtype),
            b_zr.astype(jnp.float32),
            b_q.astype(jnp.float32))


def convgru_ref(h, x, raw_params):
    """Pure-JAX f32 reference matching the PyTorch forward exactly (NCL)."""
    Wz, bz, Wr, br, Wq, bq = raw_params

    def conv1x1(W, b, inp):
        return jnp.einsum('oc,ncl->nol', W, inp) + b[None, :, None]

    hx = jnp.concatenate([h, x], axis=1)
    z = jax.nn.sigmoid(conv1x1(Wz, bz, hx))
    r = jax.nn.sigmoid(conv1x1(Wr, br, hx))
    rhx = jnp.concatenate([r * h, x], axis=1)
    q = jnp.tanh(conv1x1(Wq, bq, rhx))
    return (1.0 - z) * h + z * q


if __name__ == "__main__":
    # Small shapes consistent with the module defaults (input_dim=128,
    # hidden_dim=64).  L=200 deliberately exercises the lane-pad (->256) path.
    N, D, H, L = 2, 128, 64, 200

    key = jax.random.PRNGKey(0)
    k_h, k_x, k_p = jax.random.split(key, 3)
    h = jax.random.normal(k_h, (N, H, L), dtype=jnp.float32)
    x = jax.random.normal(k_x, (N, D, L), dtype=jnp.float32)

    raw_params = make_params(k_p, D, H)                  # f32 PyTorch-style
    fused_params = fuse_params(raw_params, H)            # bf16 fused weights

    out = convgru_pallas(h, x, fused_params)
    out = jax.block_until_ready(out)

    ref = convgru_ref(h, x, raw_params)
    assert out.shape == (N, H, L)
    err = float(jnp.max(jnp.abs(out - ref)))
    # bf16 MXU operands / activations -> looser tolerance than pure f32.
    assert err < 5e-2, f"mismatch vs reference: max abs err = {err}"

    print("KERNEL_OK")
</pallas_src>

<mosaic_0001>
module attributes {stable_mosaic.version = 11 : i64} {
  func.func @convgru_kernel(%arg0: i32, %arg1: i32, %arg2: memref<1x64x256xbf16, #tpu.memory_space<vmem>>, %arg3: memref<1x128x256xbf16, #tpu.memory_space<vmem>>, %arg4: memref<128x64xbf16, #tpu.memory_space<vmem>>, %arg5: memref<192x128xbf16, #tpu.memory_space<vmem>>, %arg6: memref<64x64xbf16, #tpu.memory_space<vmem>>, %arg7: memref<128x1xf32, #tpu.memory_space<vmem>>, %arg8: memref<64x1xf32, #tpu.memory_space<vmem>>, %arg9: memref<1x64x256xf32, #tpu.memory_space<vmem>>) attributes {dimension_semantics = [#tpu.dimension_semantics<parallel>, #tpu.dimension_semantics<parallel>], iteration_bounds = array<i64: 2, 1>, scalar_prefetch = 0 : i64, scratch_operands = 0 : i64, tpu.core_type = #tpu.core_type<tc>, window_params = [{transform_indices = @transform_0, window_bounds = array<i64: 1, 64, 256>}, {transform_indices = @transform_1, window_bounds = array<i64: 1, 128, 256>}, {pipeline_mode = #tpu.pipeline_mode<synchronous>, transform_indices = @transform_2, window_bounds = array<i64: 128, 64>}, {pipeline_mode = #tpu.pipeline_mode<synchronous>, transform_indices = @transform_3, window_bounds = array<i64: 192, 128>}, {pipeline_mode = #tpu.pipeline_mode<synchronous>, transform_indices = @transform_4, window_bounds = array<i64: 64, 64>}, {pipeline_mode = #tpu.pipeline_mode<synchronous>, transform_indices = @transform_5, window_bounds = array<i64: 128, 1>}, {pipeline_mode = #tpu.pipeline_mode<synchronous>, transform_indices = @transform_6, window_bounds = array<i64: 64, 1>}, {transform_indices = @transform_7, window_bounds = array<i64: 1, 64, 256>}]} {
    %c0 = arith.constant 0 : index
    %c0_0 = arith.constant 0 : index
    %c0_1 = arith.constant 0 : index
    %0 = vector.load %arg2[%c0, %c0_0, %c0_1] : memref<1x64x256xbf16, #tpu.memory_space<vmem>>, vector<1x64x256xbf16>
    %1 = vector.shape_cast %0 : vector<1x64x256xbf16> to vector<64x256xbf16>
    %c0_2 = arith.constant 0 : index
    %c0_3 = arith.constant 0 : index
    %c0_4 = arith.constant 0 : index
    %2 = vector.load %arg3[%c0_2, %c0_3, %c0_4] : memref<1x128x256xbf16, #tpu.memory_space<vmem>>, vector<1x128x256xbf16>
    %3 = vector.shape_cast %2 : vector<1x128x256xbf16> to vector<128x256xbf16>
    %c0_5 = arith.constant 0 : index
    %c0_6 = arith.constant 0 : index
    %4 = vector.load %arg5[%c0_5, %c0_6] : memref<192x128xbf16, #tpu.memory_space<vmem>>, vector<192x128xbf16>
    %cst = arith.constant dense<0.000000e+00> : vector<192x256xf32>
    %5 = tpu.matmul %4, %3, %cst {dimension_numbers = #tpu.dot_dimension_numbers<[1], [0], [0], [1], [0, 0, 1, 1], [], []>} : vector<192x128xbf16>, vector<128x256xbf16>, vector<192x256xf32> -> vector<192x256xf32>
    %c0_7 = arith.constant 0 : index
    %c0_8 = arith.constant 0 : index
    %6 = vector.load %arg4[%c0_7, %c0_8] : memref<128x64xbf16, #tpu.memory_space<vmem>>, vector<128x64xbf16>
    %cst_9 = arith.constant dense<0.000000e+00> : vector<128x256xf32>
    %7 = tpu.matmul %6, %1, %cst_9 {dimension_numbers = #tpu.dot_dimension_numbers<[1], [0], [0], [1], [0, 0, 1, 1], [], []>} : vector<128x64xbf16>, vector<64x256xbf16>, vector<128x256xf32> -> vector<128x256xf32>
    %8 = vector.extract_strided_slice %5 {offsets = [0, 0], sizes = [128, 256], strides = [1, 1]} : vector<192x256xf32> to vector<128x256xf32>
    %9 = arith.addf %7, %8 : vector<128x256xf32>
    %c0_10 = arith.constant 0 : index
    %c0_11 = arith.constant 0 : index
    %10 = vector.load %arg7[%c0_10, %c0_11] : memref<128x1xf32, #tpu.memory_space<vmem>>, vector<128x1xf32>
    %11 = vector.broadcast %10 : vector<128x1xf32> to vector<128x256xf32>
    %12 = arith.addf %9, %11 : vector<128x256xf32>
    %13 = arith.negf %12 : vector<128x256xf32>
    %14 = math.exp %13 : vector<128x256xf32>
    %cst_12 = arith.constant 1.000000e+00 : f32
    %15 = vector.broadcast %cst_12 : f32 to vector<128x256xf32>
    %16 = arith.addf %15, %14 : vector<128x256xf32>
    %17 = arith.divf %15, %16 : vector<128x256xf32>
    %18 = vector.extract_strided_slice %17 {offsets = [0, 0], sizes = [64, 256], strides = [1, 1]} : vector<128x256xf32> to vector<64x256xf32>
    %19 = vector.extract_strided_slice %17 {offsets = [64, 0], sizes = [64, 256], strides = [1, 1]} : vector<128x256xf32> to vector<64x256xf32>
    %20 = arith.extf %1 : vector<64x256xbf16> to vector<64x256xf32>
    %21 = arith.mulf %19, %20 : vector<64x256xf32>
    %22 = arith.truncf %21 : vector<64x256xf32> to vector<64x256xbf16>
    %c0_13 = arith.constant 0 : index
    %c0_14 = arith.constant 0 : index
    %23 = vector.load %arg6[%c0_13, %c0_14] : memref<64x64xbf16, #tpu.memory_space<vmem>>, vector<64x64xbf16>
    %cst_15 = arith.constant dense<0.000000e+00> : vector<64x256xf32>
    %24 = tpu.matmul %23, %22, %cst_15 {dimension_numbers = #tpu.dot_dimension_numbers<[1], [0], [0], [1], [0, 0, 1, 1], [], []>} : vector<64x64xbf16>, vector<64x256xbf16>, vector<64x256xf32> -> vector<64x256xf32>
    %25 = vector.extract_strided_slice %5 {offsets = [128, 0], sizes = [64, 256], strides = [1, 1]} : vector<192x256xf32> to vector<64x256xf32>
    %26 = arith.addf %24, %25 : vector<64x256xf32>
    %c0_16 = arith.constant 0 : index
    %c0_17 = arith.constant 0 : index
    %27 = vector.load %arg8[%c0_16, %c0_17] : memref<64x1xf32, #tpu.memory_space<vmem>>, vector<64x1xf32>
    %28 = vector.broadcast %27 : vector<64x1xf32> to vector<64x256xf32>
    %29 = arith.addf %26, %28 : vector<64x256xf32>
    %30 = math.tanh %29 : vector<64x256xf32>
    %cst_18 = arith.constant 1.000000e+00 : f32
    %31 = vector.broadcast %cst_18 : f32 to vector<64x256xf32>
    %32 = arith.subf %31, %18 : vector<64x256xf32>
    %33 = arith.mulf %32, %20 : vector<64x256xf32>
    %34 = arith.mulf %18, %30 : vector<64x256xf32>
    %35 = arith.addf %33, %34 : vector<64x256xf32>
    %c0_19 = arith.constant 0 : index
    %c0_20 = arith.constant 0 : index
    %c0_21 = arith.constant 0 : index
    %36 = vector.load %arg9[%c0_19, %c0_20, %c0_21] : memref<1x64x256xf32, #tpu.memory_space<vmem>>, vector<1x64x256xf32>
    %37 = vector.shape_cast %36 : vector<1x64x256xf32> to vector<64x256xf32>
    %38 = vector.shape_cast %35 : vector<64x256xf32> to vector<1x64x256xf32>
    tpu.vector_store %arg9[%c0_19, %c0_20, %c0_21], %38 {strides = array<i32>} : memref<1x64x256xf32, #tpu.memory_space<vmem>>, vector<1x64x256xf32>,
    return
  }
  func.func @transform_0(%arg0: i32, %arg1: i32) -> (i32, i32, i32) {
    %c0_i32 = arith.constant 0 : i32
    %c0_i32_0 = arith.constant 0 : i32
    return %arg0, %c0_i32, %arg1 : i32, i32, i32
  }
  func.func @transform_1(%arg0: i32, %arg1: i32) -> (i32, i32, i32) {
    %c0_i32 = arith.constant 0 : i32
    %c0_i32_0 = arith.constant 0 : i32
    return %arg0, %c0_i32, %arg1 : i32, i32, i32
  }
  func.func @transform_2(%arg0: i32, %arg1: i32) -> (i32, i32) {
    %c0_i32 = arith.constant 0 : i32
    %c0_i32_0 = arith.constant 0 : i32
    %c0_i32_1 = arith.constant 0 : i32
    return %c0_i32, %c0_i32_0 : i32, i32
  }
  func.func @transform_3(%arg0: i32, %arg1: i32) -> (i32, i32) {
    %c0_i32 = arith.constant 0 : i32
    %c0_i32_0 = arith.constant 0 : i32
    %c0_i32_1 = arith.constant 0 : i32
    return %c0_i32, %c0_i32_0 : i32, i32
  }
  func.func @transform_4(%arg0: i32, %arg1: i32) -> (i32, i32) {
    %c0_i32 = arith.constant 0 : i32
    %c0_i32_0 = arith.constant 0 : i32
    %c0_i32_1 = arith.constant 0 : i32
    return %c0_i32, %c0_i32_0 : i32, i32
  }
  func.func @transform_5(%arg0: i32, %arg1: i32) -> (i32, i32) {
    %c0_i32 = arith.constant 0 : i32
    %c0_i32_0 = arith.constant 0 : i32
    %c0_i32_1 = arith.constant 0 : i32
    return %c0_i32, %c0_i32_0 : i32, i32
  }
  func.func @transform_6(%arg0: i32, %arg1: i32) -> (i32, i32) {
    %c0_i32 = arith.constant 0 : i32
    %c0_i32_0 = arith.constant 0 : i32
    %c0_i32_1 = arith.constant 0 : i32
    return %c0_i32, %c0_i32_0 : i32, i32
  }
  func.func @transform_7(%arg0: i32, %arg1: i32) -> (i32, i32, i32) {
    %c0_i32 = arith.constant 0 : i32
    %c0_i32_0 = arith.constant 0 : i32
    return %arg0, %c0_i32, %arg1 : i32, i32, i32
  }
}

</mosaic_0001>

<bundles_post_ra>
// kernel: tpu_custom_call.1
= control target key start
LH: loop header
LB: loop body
LE: loop exit
PB: predicated region body
PF: predicated region fallthrough
CT: control target
= control target key end

     0   :  { %s3113_s0 = inlined_call_operand.hbm [shape: bf16[2,64,256], index: 0, kind: input, shape index: {}]   ;;  %s3114_s1 = inlined_call_operand.vmem [shape: bf16[2,128,256], index: 1, kind: input, shape index: {}]   ;;  %s3115_s2 = inlined_call_operand.vmem [shape: bf16[128,64], index: 2, kind: input, shape index: {}]   ;;  %s3116_s3 = inlined_call_operand.hbm [shape: bf16[192,128], index: 3, kind: input, shape index: {}]   ;;  %s3117_s4 = inlined_call_operand.vmem [shape: bf16[64,64], index: 4, kind: input, shape index: {}]   ;;  %s3118_s5 = inlined_call_operand.vmem [shape: f32[128,1], index: 5, kind: input, shape index: {}]   ;;  %s3119_s6 = inlined_call_operand.vmem [shape: f32[64,1], index: 6, kind: input, shape index: {}]   ;;  %s3120_s7 = inlined_call_operand.hbm [shape: f32[2,64,256], index: 7, kind: output, shape index: {}]  }
   0x1   :  { %3140 = sst [smem:[#allocation13_spill]] %s3116_s3 }
   0x2   :  { %12 = vsyncpa [#allocation3], 0 }
   0x3   :  { %14 = vsyncpa [#allocation3 + $0x1], 0 }
   0x4   :  { %15 = vsyncpa [#allocation6], 0 }
   0x5   :  { %16 = vsyncpa [#allocation4], 0 }
   0x6   :  { %18 = vsyncpa [#allocation4 + $0x1], 0  ;;  %s2376_s24 = smov 0   ;;  %s2378_s25 = smov 0  }
   0x7   :  { %s2380_s26 = smov 0   ;;  %s2382_s27 = smov 0  }
   0x8   :  { %s2384_s28 = smov 0   ;;  %s2386_s29 = smov 0  }
   0x9 LB: > { %s1720_s30 = sadd.s32 4294967295, %s2324_s29   ;;  %s1721_s8 = sadd.s32 4294967294, %s2324_s29   ;;  %s2324_s29 = sphi %s2386_s29, %s24_s29   ;;  %s2320_s28 = sphi %s2384_s28, %s3183_s28   ;;  %s2316_s27 = sphi %s2382_s27, %s3182_s27   ;;  %s2312_s26 = sphi %s2380_s26, %s3181_s26   ;;  %s2308_s25 = sphi %s2378_s25, %s3180_s25   ;;  %s2304_s24 = sphi %s2376_s24, %s3179_s24  }
   0xa   : > { %p58_p0 = scmp.ne.s32.totalorder %s2308_s25, %s2304_s24  ;;  %p2410_p1 = scmp.eq.s32.totalorder %s1720_s30, 0 }
   0xb   : > { %p2414_p2 = scmp.eq.s32.totalorder %s1720_s30, 1  ;;  %p223_p3 = scmp.eq.s32.totalorder %s1721_s8, 1 }
   0xc   : > { %s3141_s9 = scalar_select %p2410_p1, 1, 0 }
   0xd   : > { %s3142_s10 = scalar_select %p2414_p2, 1, 0 }
   0xe   : > { %p2420_p4 = por %p2410_p1, %p58_p0  ;;  %p1722_p5 = scmp.ge.s32.totalorder %s2324_s29, 1 }
   0xf   : > { %p2425_p6 = por %p223_p3, %p58_p0  ;;  %p230_p7 = scmp.lt.s32.totalorder %s2324_s29, 3 }
  0x10   : > { %s3143_s11 = scalar_select %p2420_p4, 1, 0 }
  0x11   : > { %s3144_s12 = scalar_select %p2425_p6, 1, 0 }
  0x12   : > { %p2430_p8 = pnand %p1722_p5, %p230_p7  ;;  %s2326_s14 = smov [#allocation5]  }
  0x13   : > { %s245_s15 = sshll.u32 %s2326_s14, 4  ;;  %s36_s17 = sadd.s32 1, %s2320_s28  ;;  %s246_s15 = int_to_ptr.vmem [resolvable:$true] %s245_s15 }
  0x14   : > { %s3145_s13 = scalar_select %p2430_p8, 1, 0 }
  0x15   : > { %p1890_p9 = pneg %p2430_p8  ;;  %s3147_s3 = sld [smem:[#allocation13_spill]] }
  0x17   : > { %p2439_p11 = pnand %p1890_p9, %p2410_p1 }
  0x19   : > { %p2182_p13 = pneg %p2439_p11 }
  0x1b   : > { %s2180_s20 = scalar_lea.hbm %s3147_s3, 1536 }
  0x1c   : > { %p2181_p12 = scmp.ne.s32.totalorder %s3147_s3, %s2180_s20  ;;  %p2187_p5 = scmp.lt.u32.totalorder %s2180_s20, %s3147_s3 }
  0x1e   : > { %p2183_p0 = pnand %p2182_p13, %p2181_p12 }
  0x20   : > { %p2184_p3 = pneg %p2183_p0 }
  0x22   : > { %p2189_p7 = pnand %p2187_p5, %p2184_p3 }
  0x24   : > { %2192 = shalt.err (!%p2189_p7)
}
  0x25   : > { %s2193_s8 = scalar_lea.vmem %s246_s15, 1536  ;;  %p2201_p1 = scmp.lt.s32.totalorder %s246_s15, %s246_s15 }
  0x26   : > { %p2194_p9 = scmp.ne.s32.totalorder %s246_s15, %s2193_s8  ;;  %p2202_p4 = scmp.lt.s32.totalorder %s2193_s8, %s2193_s8 }
  0x28   : > { %p2196_p10 = pnand %p2194_p9, %p2182_p13  ;;  %p2203_p8 = por %p2202_p4, %p2201_p1 }
  0x2a   : > { %p2197_p6 = pneg %p2196_p10 }
  0x2c   : > { %p2204_p2 = pnand %p2203_p8, %p2197_p6 }
  0x2e   : > { %2207 = shalt.err (!%p2204_p2)
}
  0x2f   : > { %s2327_s14 = smov 64   ;;  %s2328_s18 = smov 4  }
  0x30   : > { %1893 = dma.hbm_to_vmem [thread:$0]  (!%p2439_p11), %s3147_s3, 1536, %s246_s15, [#allocation6], %s2327_s14, %s2327_s14, %s2328_s18  }
  0x31   : > { %p38_p1 = scmp.ge.s32.totalorder %s36_s17, 2  ;;  %s45_s21 = sadd.s32 1, %s2312_s26 }
  0x32   : > { %p52_p2 = scmp.ne.s32.totalorder %s2312_s26, %s2308_s25  ;;  %p53_p4 = scmp.eq.s32.totalorder %s2324_s29, 0 }
  0x33   : > { %s3185_s17 = smov (%p38_p1, %s36_s17), 0  ;;  %p3149_p8 = scmp.ne.s32.totalorder %s3142_s10, 0 }
  0x34   : > { %p2466_p6 = por %p53_p4, %p52_p2  ;;  %s40_s16 = ssub.s32 %s2320_s28, %s3185_s17 }
  0x35   : > { %p2472_p10 = por %p3149_p8, %p52_p2  ;;  %p1903_p12 = scmp.lt.s32.totalorder %s2324_s29, 2 }
  0x36   : > { %p43_p11 = scmp.eq.s32.totalorder %s40_s16, 0  ;;  %s268_s15 = sand.u32 1, %s2312_s26  }
  0x37   : > { %s1725_s30 = sshll.u32 %s268_s15, 6  ;;  %s1831_s14 = sshll.u32 %s2320_s28, 10 }
  0x38   : > { %s2481_s8 = scalar_select %p43_p11, %s2312_s26, %s45_s21  }
  0x39   : > { %s2487_s20 = scalar_lea.hbm %s3113_s0, %s1831_s14  ;;  %s272_s10 = scalar_lea.vmem [#allocation2], %s1725_s30 }
  0x3a   : > { %s281_s3 = sshll.u32 %s272_s10, 4  ;;  %p2493_p13 = pnand %p1903_p12, %p2466_p6  ;;  %s2489_s3 = int_to_ptr.vmem [resolvable:$true] %s281_s3 }
  0x3b   : > { %s2497_s21 = scalar_lea.sflag [#allocation3], %s268_s15  ;;  %s2208_s18 = scalar_lea.hbm %s2487_s20, 1024 }
  0x3c   : > { %p2209_p0 = scmp.ne.s32.totalorder %s2487_s20, %s2208_s18  ;;  %p2210_p3 = pneg %p2493_p13 }
  0x3d   : > { %s2213_s22 = scalar_lea.hbm %s3113_s0, 2048  ;;  %p2214_p9 = scmp.lt.u32.totalorder %s2487_s20, %s3113_s0 }
  0x3e   : > { %p2211_p5 = pnand %p2210_p3, %p2209_p0  ;;  %p2215_p1 = scmp.lt.u32.totalorder %s2213_s22, %s2208_s18 }
  0x3f   : > { %p2217_p4 = scmp.lt.u32.totalorder %s2208_s18, %s2487_s20 }
  0x40   : > { %p2212_p7 = pneg %p2211_p5  ;;  %p2216_p2 = por %p2215_p1, %p2214_p9 }
  0x42   : > { %p2218_p6 = por %p2217_p4, %p2216_p2 }
  0x44   : > { %p2219_p8 = pnand %p2218_p6, %p2212_p7 }
  0x46   : > { %2222 = shalt.err (!%p2219_p8)
}
  0x47   : > { %s2223_s15 = scalar_lea.vmem %s2489_s3, 1024  ;;  %s2329_s30 = smov [#allocation2]  }
  0x48   : > { %p2224_p12 = scmp.ne.s32.totalorder %s2489_s3, %s2223_s15  ;;  %s2228_s14 = sshll.u32 %s2329_s30, 4  ;;  %s2229_s14 = int_to_ptr.vmem [resolvable:$false] %s2228_s14 }
  0x49   : > { %s2230_s19 = scalar_lea.vmem %s2229_s14, 2048  ;;  %p2231_p5 = scmp.lt.s32.totalorder %s2489_s3, %s2229_s14 }
  0x4a   : > { %p2226_p11 = pnand %p2224_p12, %p2210_p3  ;;  %p2232_p9 = scmp.lt.s32.totalorder %s2230_s19, %s2223_s15 }
  0x4c   : > { %p2227_p0 = pneg %p2226_p11  ;;  %p2233_p1 = por %p2232_p9, %p2231_p5 }
  0x4e   : > { %p2234_p2 = pnand %p2233_p1, %p2227_p0 }
  0x50   : > { %2237 = shalt.err (!%p2234_p2)
}
  0x51   : > { %s2330_s18 = smov 128   ;;  %s2331_s22 = smov 8  }
  0x52   : > { %1897 = dma.hbm_to_vmem [thread:$0]  (!%p2493_p13), %s2487_s20, 1024, %s2489_s3, %s2497_s21, %s2330_s18, %s2330_s18, %s2331_s22  }
  0x53   : > { %p3152_p3 = scmp.ne.s32.totalorder %s3145_s13, 0 }
  0x55   : > { %306 = sbr.rel (%p3152_p3) target bundleno = 723 (0x2d3), region = 48 }
  0x5c   : > { %s2528_s10 = sand.u32 1, %s2308_s25   ;;  %p3153_p7 = scmp.ne.s32.totalorder %s3143_s11, 0 }
  0x5d   : > { %s1729_s15 = sshll.u32 %s2528_s10, 6  ;;  %s309_s30 = scalar_lea.sflag [#allocation3], %s2528_s10 }
  0x5e   : > { %s2532_s14 = scalar_lea.vmem [#allocation2], %s1729_s15 }
  0x5f   : > { %2291 = dma.done.wait (%p3153_p7), %s309_s30, 1024  }
  0x60   : > { %2293 = vsyncadd (%p3153_p7), %s309_s30, 4294966272  ;;  %p3154_p13 = scmp.ne.s32.totalorder %s3141_s9, 0 }
  0x62   : > { %2295 = dma.done.wait (%p3154_p13), [#allocation6], 1536  }
  0x63   : > { %2297 = vsyncadd (%p3154_p13), [#allocation6], 4294965760  ;;  %p358_p4 = scmp.lt.s32.totalorder %s2316_s27, 1  ;;  %v3125_v0 = vmov 0   ;;  %v2559_v6 = vld [vmem:[%s2532_s14] sm:$0xff]  ;;  %v2562_v7 = vld [vmem:[%s2532_s14 + $0x8] sm:$0xff] }
  0x64   : > { %875 = vmatprep.mubr.bf16.mxu0 %v3125_v0  ;;  %601 = vmatprep.mubr.bf16.mxu1 %v3125_v0  ;;  %v1771_v8 = vcombine.high %v2559_v6, %v2562_v7  ;;  %v1770_v9 = vcombine.low %v2559_v6, %v2562_v7  ;;  %v2570_v11 = vld [vmem:[%s2532_s14 + $0x10] sm:$0xff]  ;;  %v2573_v12 = vld [vmem:[%s2532_s14 + $0x18] sm:$0xff]  ;;  %v2581_v16 = vld [vmem:[%s2532_s14 + $0x20] sm:$0xff]  ;;  %vm818_vm0 = vcmask 523264   ;;  %s2333_s19 = smov [#allocation7]  }
  0x65   : > { %s359_s3 = scalar_select %p358_p4, %s2316_s27, 1  ;;  %1962 = vset.pattern.permute.xlu0 %v3125_v0  ;;  %1963 = vset.pattern.permute.xlu1 %v3125_v0  ;;  %v1773_v14 = vcombine.high %v2570_v11, %v2573_v12  ;;  %v1772_v15 = vcombine.low %v2570_v11, %v2573_v12  ;;  %v2584_v17 = vld [vmem:[%s2532_s14 + $0x28] sm:$0xff]  ;;  %v2590_v20 = vld [vmem:[%s2532_s14 + $0x30] sm:$0xff]  ;;  %v2593_v21 = vld [vmem:[%s2532_s14 + $0x38] sm:$0xff] }
  0x66   : > { %843 = vmatprep.subr.bf16.mxu0 %v1771_v8  ;;  %v1775_v18 = vcombine.high %v2581_v16, %v2584_v17  ;;  %v1774_v23 = vcombine.low %v2581_v16, %v2584_v17  ;;  %v1777_v24 = vcombine.high %v2590_v20, %v2593_v21  ;;  %v1776_v27 = vcombine.low %v2590_v20, %v2593_v21  ;;  %v1996_v30 = vld [vmem:[%s3115_s2] sm:$0xff]   ;;  %v1998_v34 = vld [vmem:[%s3115_s2 + $0x8] sm:$0xff]   ;;  %v966_v36 = vld [vmem:[%s3118_s5 + $0x50] sm:$0xff]  ;;  %s1731_s14 = sshll.u32 %s2528_s10, 7  ;;  %s2242_s18 = sshll.u32 %s2333_s19, 4  ;;  %s2243_s18 = int_to_ptr.vmem [resolvable:$false] %s2242_s18 }
  0x67   : > { %s1832_s11 = sshll.u32 %s359_s3, 7  ;;  %844 = vmatpush1.bf16.msra.mxu0 %v1770_v9  ;;  %v964_v35 = vld [vmem:[%s3118_s5 + $0x40] sm:$0xff]  ;;  %1024 = vperm.xlu1 %1963, %v966_v36   ;;  %v965_v38 = vld [vmem:[%s3118_s5 + $0x48] sm:$0xff]  ;;  %v967_v39 = vld [vmem:[%s3118_s5 + $0x58] sm:$0xff]  ;;  %s3008_s3 = scalar_lea.vmem [#allocation7], %s1731_s14 }
  0x68   : > { %s2551_s9 = scalar_lea.vmem %s3114_s1, %s1832_s11  ;;  %845 = vmatprep.subr.bf16.mxu0 %v1773_v14  ;;  %v1997_v37 = vld [vmem:[#allocation5] sm:$0xff]   ;;  %1014 = vperm.xlu0 %1962, %v964_v35   ;;  %v1999_v41 = vld [vmem:[#allocation5 + $0x8] sm:$0xff]   ;;  %v2000_v42 = vld [vmem:[%s3115_s2 + $0x10] sm:$0xff]   ;;  %s1833_s11 = sshll.u32 %s2316_s27, 11 }
  0x69   : > { %v1964_v1 = vld [vmem:[%s2551_s9 + $0x4] ss:$8 sps:$4 sm:$0xff]   ;;  %v1966_v2 = vld [vmem:[%s2551_s9] ss:$8 sps:$4 sm:$0xff]   ;;  %v1967_v3 = vld [vmem:[%s2551_s9 + $0x14] ss:$8 sps:$4 sm:$0xff]   ;;  %s3058_s16 = scalar_lea.hbm %s3120_s7, %s1833_s11 }
  0x6a   : > { %569 = vmatprep.subr.bf16.mxu1 %v1964_v1  ;;  %v1969_v4 = vld [vmem:[%s2551_s9 + $0x10] ss:$8 sps:$4 sm:$0xff]   ;;  %v1970_v5 = vld [vmem:[%s2551_s9 + $0x24] ss:$8 sps:$4 sm:$0xff]   ;;  %v1972_v10 = vld [vmem:[%s2551_s9 + $0x20] ss:$8 sps:$4 sm:$0xff]  }
  0x6b   : > { %570 = vmatpush1.bf16.msra.mxu1 %v1966_v2  ;;  %v1973_v13 = vld [vmem:[%s2551_s9 + $0x34] ss:$8 sps:$4 sm:$0xff]   ;;  %v1975_v19 = vld [vmem:[%s2551_s9 + $0x30] ss:$8 sps:$4 sm:$0xff]   ;;  %v1978_v22 = vld [vmem:[%s2551_s9 + $0x44] ss:$8 sps:$4 sm:$0xff]   ;;  %846 = vmatpush1.bf16.msra.mxu0 %v1772_v15 }
  0x6c   : > { %571 = vmatprep.subr.bf16.mxu1 %v1967_v3  ;;  %847 = vmatprep.subr.bf16.mxu0 %v1775_v18  ;;  %v1980_v25 = vld [vmem:[%s2551_s9 + $0x40] ss:$8 sps:$4 sm:$0xff]   ;;  %v1983_v26 = vld [vmem:[%s2551_s9 + $0x54] ss:$8 sps:$4 sm:$0xff]   ;;  %v1985_v28 = vld [vmem:[%s2551_s9 + $0x50] ss:$8 sps:$4 sm:$0xff]  }
  0x6d   : > { %v1988_v29 = vld [vmem:[%s2551_s9 + $0x64] ss:$8 sps:$4 sm:$0xff]   ;;  %v1990_v31 = vld [vmem:[%s2551_s9 + $0x60] ss:$8 sps:$4 sm:$0xff]   ;;  %v1993_v32 = vld [vmem:[%s2551_s9 + $0x74] ss:$8 sps:$4 sm:$0xff]   ;;  %1019 = vperm.xlu0 %1962, %v965_v38   ;;  %1029 = vperm.xlu1 %1963, %v967_v39  }
  0x6e   : > { %v1995_v33 = vld [vmem:[%s2551_s9 + $0x70] ss:$8 sps:$4 sm:$0xff]   ;;  %v968_v40 = vld [vmem:[%s3118_s5 + $0x60] sm:$0xff]  ;;  %v969_v43 = vld [vmem:[%s3118_s5 + $0x68] sm:$0xff]  ;;  %s1605_s13 = sshll.u32 %s3008_s3, 4  ;;  %s1590_s27 = scalar_lea.sflag [#allocation4], %s2528_s10  ;;  %s3060_s13 = int_to_ptr.vmem [resolvable:$true] %s1605_s13 }
  0x6f   : > { %572 = vmatpush1.bf16.msra.mxu1 %v1969_v4  ;;  %848 = vmatpush1.bf16.msra.mxu0 %v1774_v23  ;;  %v970_v44 = vld [vmem:[%s3118_s5 + $0x70] sm:$0xff]  ;;  %v971_v45 = vld [vmem:[%s3118_s5 + $0x78] sm:$0xff]  ;;  %v956_v46 = vld [vmem:[%s3118_s5] sm:$0xff]  ;;  %s2238_s21 = scalar_lea.vmem %s3060_s13, 2048  ;;  %s2244_s22 = scalar_lea.vmem %s2243_s18, 4096 }
  0x70   : > { %573 = vmatprep.subr.bf16.mxu1 %v1970_v5  ;;  %849 = vmatprep.subr.bf16.mxu0 %v1777_v24  ;;  %v2002_v47 = vld [vmem:[%s3115_s2 + $0x18] sm:$0xff]   ;;  %v957_v48 = vld [vmem:[%s3118_s5 + $0x8] sm:$0xff]  ;;  %v2001_v49 = vld [vmem:[#allocation5 + $0x10] sm:$0xff]   ;;  %p2239_p6 = scmp.ne.s32.totalorder %s3060_s13, %s2238_s21  ;;  %p2245_p11 = scmp.lt.s32.totalorder %s3060_s13, %s2243_s18 }
  0x71   : > { %1034 = vperm.xlu0 %1962, %v968_v40   ;;  %1039 = vperm.xlu1 %1963, %v969_v43   ;;  %v958_v50 = vld [vmem:[%s3118_s5 + $0x10] sm:$0xff]  ;;  %v959_v51 = vld [vmem:[%s3118_s5 + $0x18] sm:$0xff]  ;;  %v960_v52 = vld [vmem:[%s3118_s5 + $0x20] sm:$0xff]  ;;  %p2246_p0 = scmp.lt.s32.totalorder %s2244_s22, %s2238_s21 }
  0x72   : > { %v2004_v53 = vld [vmem:[%s3115_s2 + $0x20] sm:$0xff]   ;;  %v961_v54 = vld [vmem:[%s3118_s5 + $0x28] sm:$0xff]  ;;  %v2003_v55 = vld [vmem:[#allocation5 + $0x18] sm:$0xff]   ;;  %p2240_p8 = pnand %p2239_p6, %p2472_p10 }
  0x73   : > { %574 = vmatpush1.bf16.msra.mxu1 %v1972_v10  ;;  %850 = vmatpush1.bf16.msra.mxu0 %v1776_v27  ;;  %v962_v56 = vld [vmem:[%s3118_s5 + $0x30] sm:$0xff]  ;;  %v963_v57 = vld [vmem:[%s3118_s5 + $0x38] sm:$0xff]  ;;  %v1429_v58 = vld [vmem:[%s3119_s6] sm:$0xff]  ;;  %p2247_p5 = por %p2246_p0, %p2245_p11 }
  0x74   : > { %575 = vmatprep.subr.bf16.mxu1 %v1973_v13  ;;  %v2007_v59 = vld [vmem:[%s3115_s2 + $0x28] sm:$0xff]   ;;  %v2005_v61 = vld [vmem:[#allocation5 + $0x20] sm:$0xff]   ;;  %v1431_v62 = vld [vmem:[%s3119_s6 + $0x10] sm:$0xff]  ;;  %p2241_p12 = pneg %p2240_p8 }
  0x75   : > { %1044 = vperm.xlu0 %1962, %v970_v44   ;;  %1049 = vperm.xlu1 %1963, %v971_v45   ;;  %v1430_v60 = vld [vmem:[%s3119_s6 + $0x8] sm:$0xff]  ;;  %v1432_v63 = vld [vmem:[%s3119_s6 + $0x18] sm:$0xff]  ;;  %v1433_v1 = vld [vmem:[%s3119_s6 + $0x20] sm:$0xff] }
  0x76   : > { %1778 = vmatmul.mubr.msk.bf16.vlgmr.msra.gmra.mrb[0].mxu0 %vm818_vm0, %v1996_v30  ;;  %v2009_v2 = vld [vmem:[%s3115_s2 + $0x30] sm:$0xff]   ;;  %v1434_v3 = vld [vmem:[%s3119_s6 + $0x28] sm:$0xff]  ;;  %v1436_v8 = vld [vmem:[%s3119_s6 + $0x38] sm:$0xff]  ;;  %p2248_p9 = pnand %p2247_p5, %p2241_p12 }
  0x77   : > { %576 = vmatpush1.bf16.msra.mxu1 %v1975_v19  ;;  %885 = vmatprep.mubr.bf16.mxu0 %v3125_v0  ;;  %v2006_v4 = vld [vmem:[#allocation5 + $0x28] sm:$0xff]   ;;  %v1435_v5 = vld [vmem:[%s3119_s6 + $0x30] sm:$0xff]  ;;  %v2011_v9 = vld [vmem:[%s3115_s2 + $0x38] sm:$0xff]  }
  0x78   : > { %577 = vmatprep.subr.bf16.mxu1 %v1978_v22  ;;  %v2008_v10 = vld [vmem:[#allocation5 + $0x30] sm:$0xff]   ;;  %v2010_v13 = vld [vmem:[#allocation5 + $0x38] sm:$0xff]   ;;  %v2012_v14 = vld [vmem:[#allocation5 + $0x40] sm:$0xff]  }
  0x79   : > { %974 = vperm.xlu0 %1962, %v956_v46   ;;  %979 = vperm.xlu1 %1963, %v957_v48   ;;  %v2014_v18 = vld [vmem:[#allocation5 + $0x48] sm:$0xff]   ;;  %v2016_v24 = vld [vmem:[#allocation5 + $0x50] sm:$0xff]   ;;  %v2018_v30 = vld [vmem:[#allocation5 + $0x58] sm:$0xff]  }
  0x7b   : > { %578 = vmatpush1.bf16.msra.mxu1 %v1980_v25 }
  0x7c   : > { %579 = vmatprep.subr.bf16.mxu1 %v1983_v26 }
  0x7d   : > { %984 = vperm.xlu0 %1962, %v958_v50   ;;  %989 = vperm.xlu1 %1963, %v959_v51  }
  0x7e   : > { %1779 = vmatmul.mubr.msk.bf16.gmra.mrb[4].mxu0 %vm818_vm0, %v1998_v34 }
  0x7f   : > { %580 = vmatpush1.bf16.msra.mxu1 %v1985_v28  ;;  %895 = vmatprep.mubr.bf16.mxu0 %v3125_v0 }
  0x80   : > { %581 = vmatprep.subr.bf16.mxu1 %v1988_v29 }
  0x81   : > { %994 = vperm.xlu0 %1962, %v960_v52   ;;  %999 = vperm.xlu1 %1963, %v961_v54  }
  0x83   : > { %582 = vmatpush1.bf16.msra.mxu1 %v1990_v31 }
  0x84   : > { %583 = vmatprep.subr.bf16.mxu1 %v1993_v32 }
  0x85   : > { %1004 = vperm.xlu0 %1962, %v962_v56   ;;  %1009 = vperm.xlu1 %1963, %v963_v57  }
  0x86   : > { %1780 = vmatmul.mubr.msk.bf16.gmra.mrb[8].mxu0 %vm818_vm0, %v2000_v42 }
  0x87   : > { %584 = vmatpush1.bf16.msra.mxu1 %v1995_v33  ;;  %905 = vmatprep.mubr.bf16.mxu0 %v3125_v0 }
  0x89   : > { %1439 = vperm.xlu0 %1962, %v1429_v58   ;;  %1444 = vperm.xlu1 %1963, %v1430_v60  }
  0x8a   : > { %602 = vmatmul.mubr.bf16.vlgmr.msra.gmra.mrb[0].mxu1 %v1997_v37 }
  0x8b   : > { %611 = vmatprep.mubr.bf16.mxu1 %v3125_v0 }
  0x8d   : > { %1449 = vperm.xlu0 %1962, %v1431_v62   ;;  %1454 = vperm.xlu1 %1963, %v1432_v63  }
  0x8e   : > { %1781 = vmatmul.mubr.msk.bf16.gmra.mrb[12].mxu0 %vm818_vm0, %v2002_v47 }
  0x8f   : > { %915 = vmatprep.mubr.bf16.mxu0 %v3125_v0 }
  0x91   : > { %1459 = vperm.xlu0 %1962, %v1433_v1   ;;  %1464 = vperm.xlu1 %1963, %v1434_v3  }
  0x92   : > { %612 = vmatmul.mubr.bf16.gmra.mrb[4].mxu1 %v1999_v41 }
  0x93   : > { %621 = vmatprep.mubr.bf16.mxu1 %v3125_v0 }
  0x95   : > { %1469 = vperm.xlu0 %1962, %v1435_v5   ;;  %1474 = vperm.xlu1 %1963, %v1436_v8  }
  0x96   : > { %1782 = vmatmul.mubr.msk.bf16.gmra.mrb[16].mxu0 %vm818_vm0, %v2004_v53 }
  0x97   : > { %925 = vmatprep.mubr.bf16.mxu0 %v3125_v0 }
  0x9a   : > { %622 = vmatmul.mubr.bf16.gmra.mrb[8].mxu1 %v2001_v49 }
  0x9b   : > { %631 = vmatprep.mubr.bf16.mxu1 %v3125_v0 }
  0x9e   : > { %1783 = vmatmul.mubr.msk.bf16.gmra.mrb[20].mxu0 %vm818_vm0, %v2007_v59 }
  0x9f   : > { %935 = vmatprep.mubr.bf16.mxu0 %v3125_v0 }
  0xa2   : > { %632 = vmatmul.mubr.bf16.gmra.mrb[12].mxu1 %v2003_v55 }
  0xa3   : > { %641 = vmatprep.mubr.bf16.mxu1 %v3125_v0 }
  0xa6   : > { %1784 = vmatmul.mubr.msk.bf16.gmra.mrb[24].mxu0 %vm818_vm0, %v2009_v2 }
  0xa7   : > { %945 = vmatprep.mubr.bf16.mxu0 %v3125_v0 }
  0xaa   : > { %642 = vmatmul.mubr.bf16.gmra.mrb[16].mxu1 %v2005_v61 }
  0xab   : > { %651 = vmatprep.mubr.bf16.mxu1 %v3125_v0 }
  0xae   : > { %1785 = vmatmul.mubr.msk.bf16.gmra.mrb[28].mxu0 %vm818_vm0, %v2011_v9 }
  0xaf   : > { %1388 = vmatprep.mubr.bf16.mxu0 %v3125_v0 }
  0xb2   : > { %652 = vmatmul.mubr.bf16.gmra.mrb[20].mxu1 %v2006_v4 }
  0xb3   : > { %661 = vmatprep.mubr.bf16.mxu1 %v3125_v0 }
  0xba   : > { %662 = vmatmul.mubr.bf16.gmra.mrb[24].mxu1 %v2008_v10 }
  0xbb   : > { %671 = vmatprep.mubr.bf16.mxu1 %v3125_v0 }
  0xc2   : > { %672 = vmatmul.mubr.bf16.gmra.mrb[28].mxu1 %v2010_v13 }
  0xc3   : > { %681 = vmatprep.mubr.bf16.mxu1 %v3125_v0 }
  0xca   : > { %682 = vmatmul.mubr.bf16.gmra.mrb[32].mxu1 %v2012_v14 }
  0xcb   : > { %691 = vmatprep.mubr.bf16.mxu1 %v3125_v0 }
  0xd2   : > { %692 = vmatmul.mubr.bf16.gmra.mrb[36].mxu1 %v2014_v18 }
  0xd3   : > { %701 = vmatprep.mubr.bf16.mxu1 %v3125_v0 }
  0xda   : > { %702 = vmatmul.mubr.bf16.gmra.mrb[40].mxu1 %v2016_v24 }
  0xdb   : > { %711 = vmatprep.mubr.bf16.mxu1 %v3125_v0 }
  0xe2   : > { %712 = vmatmul.mubr.bf16.gmra.mrb[44].mxu1 %v2018_v30 }
  0xe6   : > { %v2732_v19 = vpop.permute.xlu1 %1024 }
  0xe7   : > { %v2730_v15 = vpop.permute.xlu0 %1014 }
  0xec   : > { %v2734_v22 = vpop.permute.xlu0 %1019  ;;  %v2737_v23 = vpop.permute.xlu1 %1029 }
  0xf0   : > { %v2739_v25 = vpop.permute.xlu0 %1034  ;;  %v2742_v26 = vpop.permute.xlu1 %1039 }
  0xf4   : > { %v2744_v31 = vpop.permute.xlu0 %1044  ;;  %v2746_v33 = vpop.permute.xlu1 %1049 }
  0xf8   : > { %v975_v35 = vpop.permute.xlu0 %974  ;;  %v980_v44 = vpop.permute.xlu1 %979 }
  0xfc   : > { %v985_v56 = vpop.permute.xlu0 %984  ;;  %v990_v3 = vpop.permute.xlu1 %989 }
 0x149   : > { %v877_v27 = vpop.f32.mrb[0].mxu0 }
 0x14a   : > { %v879_v28 = vpop.f32.mrb[1].mxu0 }
 0x14b   : > { %v881_v29 = vpop.f32.mrb[2].mxu0 }
 0x14c   : > { %v883_v32 = vpop.f32.mrb[3].mxu0 }
 0x151   : > { %v887_v34 = vpop.f32.mrb[4].mxu0 }
 0x152   : > { %v889_v36 = vpop.f32.mrb[5].mxu0 }
 0x153   : > { %v891_v38 = vpop.f32.mrb[6].mxu0 }
 0x154   : > { %v893_v41 = vpop.f32.mrb[7].mxu0 }
 0x159   : > { %v897_v54 = vpop.f32.mrb[8].mxu0 }
 0x15a   : > { %v899_v57 = vpop.f32.mrb[9].mxu0 }
 0x15b   : > { %v901_v60 = vpop.f32.mrb[10].mxu0 }
 0x15c   : > { %v903_v63 = vpop.f32.mrb[11].mxu0 }
 0x15d   : > { %v603_v37 = vpop.f32.mrb[0].mxu1 }
 0x15e   : > { %v878_v39 = vadd.f32 %v877_v27, %v603_v37  ;;  %v605_v40 = vpop.f32.mrb[1].mxu1 }
 0x15f   : > { %v880_v42 = vadd.f32 %v879_v28, %v605_v40  ;;  %v607_v43 = vpop.f32.mrb[2].mxu1 }
 0x160   : > { %v1052_v45 = vadd.f32 %v975_v35, %v878_v39  ;;  %v882_v46 = vadd.f32 %v881_v29, %v607_v43  ;;  %v609_v47 = vpop.f32.mrb[3].mxu1  ;;  %v995_v29 = vpop.permute.xlu0 %994 }
 0x161   : > { %v1053_v48 = vadd.f32 %v975_v35, %v880_v42  ;;  %v884_v49 = vadd.f32 %v883_v32, %v609_v47  ;;  %v907_v27 = vpop.f32.mrb[12].mxu0 }
 0x162   : > { %v1786_v50 = vmul.f32 -1.442695, %v1052_v45  ;;  %v1054_v51 = vadd.f32 %v980_v44, %v882_v46  ;;  %v909_v30 = vpop.f32.mrb[13].mxu0  ;;  %v3134_v46 = vunpack.c.l.bf16 %v2559_v6 }
 0x163   : > { %v1787_v52 = vmul.f32 -1.442695, %v1053_v48  ;;  %v1055_v53 = vadd.f32 %v980_v44, %v884_v49  ;;  %v911_v35 = vpop.f32.mrb[14].mxu0  ;;  %v1000_v44 = vpop.permute.xlu1 %999 }
 0x164   : > { %2020 = vpow2.f32 %v1786_v50  ;;  %v1788_v55 = vmul.f32 -1.442695, %v1054_v51  ;;  %v2748_v39 = vpop.f32.mrb[15].mxu0 }
 0x165   : > { %2022 = vpow2.f32 %v1787_v52  ;;  %v1789_v58 = vmul.f32 -1.442695, %v1055_v53  ;;  %v613_v59 = vpop.f32.mrb[4].mxu1 }
 0x166   : > { %2024 = vpow2.f32 %v1788_v55  ;;  %v888_v61 = vadd.f32 %v887_v34, %v613_v59  ;;  %v615_v62 = vpop.f32.mrb[5].mxu1 }
 0x167   : > { %2026 = vpow2.f32 %v1789_v58  ;;  %v890_v1 = vadd.f32 %v889_v36, %v615_v62  ;;  %v617_v2 = vpop.f32.mrb[6].mxu1 }
 0x168   : > { %v1056_v4 = vadd.f32 %v985_v56, %v888_v61  ;;  %v892_v5 = vadd.f32 %v891_v38, %v617_v2  ;;  %v619_v8 = vpop.f32.mrb[7].mxu1 }
 0x169   : > { %v1057_v9 = vadd.f32 %v985_v56, %v890_v1  ;;  %v894_v10 = vadd.f32 %v893_v41, %v619_v8  ;;  %v2752_v62 = vpop.f32.mrb[16].mxu0  ;;  %v1005_v1 = vpop.permute.xlu0 %1004 }
 0x16a   : > { %v1790_v13 = vmul.f32 -1.442695, %v1056_v4  ;;  %v1058_v14 = vadd.f32 %v990_v3, %v892_v5  ;;  %v2754_v2 = vpop.f32.mrb[17].mxu0 }
 0x16b   : > { %v1791_v18 = vmul.f32 -1.442695, %v1057_v9  ;;  %v1059_v24 = vadd.f32 %v990_v3, %v894_v10  ;;  %v3129_v3 = vunpack.c.h.bf16 %v2559_v6  ;;  %v2758_v8 = vpop.f32.mrb[18].mxu0  ;;  %v3130_v9 = vunpack.c.h.bf16 %v2570_v11 }
 0x16c   : > { %2028 = vpow2.f32 %v1790_v13  ;;  %v1792_v28 = vmul.f32 -1.442695, %v1058_v14  ;;  %v3127_v10 = vunpack.c.l.bf16 %v2570_v11 }
 0x16d   : > { %2030 = vpow2.f32 %v1791_v18  ;;  %v1793_v32 = vmul.f32 -1.442695, %v1059_v24  ;;  %v623_v34 = vpop.f32.mrb[8].mxu1  ;;  %v2762_v24 = vpop.f32.mrb[19].mxu0 }
 0x16e   : > { %v2021_v36 = vpop.eup %2020  ;;  %2032 = vpow2.f32 %v1792_v28  ;;  %v898_v37 = vadd.f32 %v897_v54, %v623_v34  ;;  %v625_v38 = vpop.f32.mrb[9].mxu1  ;;  %v3131_v28 = vunpack.c.h.bf16 %v2573_v12 }
 0x16f   : > { %v2023_v40 = vpop.eup %2022  ;;  %v1180_v41 = vadd.f32 1.0, %v2021_v36  ;;  %2034 = vpow2.f32 %v1793_v32  ;;  %v900_v42 = vadd.f32 %v899_v57, %v625_v38  ;;  %v627_v43 = vpop.f32.mrb[10].mxu1  ;;  %v3133_v57 = vunpack.c.l.bf16 %v2562_v7 }
 0x170   : > { %v2025_v45 = vpop.eup %2024  ;;  %v1181_v47 = vadd.f32 1.0, %v2023_v40  ;;  %v1060_v48 = vadd.f32 %v995_v29, %v898_v37  ;;  %v902_v49 = vadd.f32 %v901_v60, %v627_v43  ;;  %v629_v50 = vpop.f32.mrb[11].mxu1  ;;  %v3135_v40 = vunpack.c.l.bf16 %v2581_v16 }
 0x171   : > { %v2027_v51 = vpop.eup %2026  ;;  %2036 = vrcp.f32 %v1180_v41  ;;  %v1182_v52 = vadd.f32 1.0, %v2025_v45  ;;  %v1061_v53 = vadd.f32 %v995_v29, %v900_v42  ;;  %v904_v54 = vadd.f32 %v903_v63, %v629_v50  ;;  %v1010_v38 = vpop.permute.xlu1 %1009 }
 0x172   : > { %2038 = vrcp.f32 %v1181_v47  ;;  %v1183_v55 = vadd.f32 1.0, %v2027_v51  ;;  %v1794_v56 = vmul.f32 -1.442695, %v1060_v48  ;;  %v1062_v58 = vadd.f32 %v1000_v44, %v902_v49 }
 0x173   : > { %2040 = vrcp.f32 %v1182_v52  ;;  %v1795_v59 = vmul.f32 -1.442695, %v1061_v53  ;;  %v1063_v61 = vadd.f32 %v1000_v44, %v904_v54  ;;  %v3128_v63 = vunpack.c.h.bf16 %v2562_v7 }
 0x174   : > { %2042 = vrcp.f32 %v1183_v55  ;;  %v1796_v60 = vmul.f32 -1.442695, %v1062_v58  ;;  %v3132_v29 = vunpack.c.l.bf16 %v2573_v12  ;;  %v2770_v55 = vpop.f32.mrb[20].mxu0 }
 0x175   : > { %2044 = vpow2.f32 %v1794_v56  ;;  %v1797_v4 = vmul.f32 -1.442695, %v1063_v61  ;;  %v633_v5 = vpop.f32.mrb[12].mxu1  ;;  %v3138_v61 = vunpack.c.l.bf16 %v2584_v17 }
 0x176   : > { %v2029_v13 = vpop.eup %2028  ;;  %2046 = vpow2.f32 %v1795_v59  ;;  %v908_v14 = vadd.f32 %v907_v27, %v633_v5  ;;  %v635_v18 = vpop.f32.mrb[13].mxu1 }
 0x177   : > { %v2031_v32 = vpop.eup %2030  ;;  %v1184_v34 = vadd.f32 1.0, %v2029_v13  ;;  %2048 = vpow2.f32 %v1796_v60  ;;  %v910_v36 = vadd.f32 %v909_v30, %v635_v18  ;;  %v637_v37 = vpop.f32.mrb[14].mxu1 }
 0x178   : > { %v2033_v41 = vpop.eup %2032  ;;  %v1185_v42 = vadd.f32 1.0, %v2031_v32  ;;  %2050 = vpow2.f32 %v1797_v4  ;;  %v1064_v43 = vadd.f32 %v1005_v1, %v908_v14  ;;  %v912_v27 = vadd.f32 %v911_v35, %v637_v37  ;;  %v639_v44 = vpop.f32.mrb[15].mxu1 }
 0x179   : > { %v2035_v45 = vpop.eup %2034  ;;  %2052 = vrcp.f32 %v1184_v34  ;;  %v1186_v47 = vadd.f32 1.0, %v2033_v41  ;;  %v1065_v48 = vadd.f32 %v1005_v1, %v910_v36  ;;  %v914_v49 = vadd.f32 %v2748_v39, %v639_v44  ;;  %v2776_v39 = vpop.f32.mrb[21].mxu0 }
 0x17a   : > { %2054 = vrcp.f32 %v1185_v42  ;;  %v1187_v50 = vadd.f32 1.0, %v2035_v45  ;;  %v1798_v51 = vmul.f32 -1.442695, %v1064_v43  ;;  %v1066_v30 = vadd.f32 %v1010_v38, %v912_v27  ;;  %v2781_v5 = vpop.f32.mrb[22].mxu0 }
 0x17b   : > { %v2768_v52 = vpop.eup %2036  ;;  %2056 = vrcp.f32 %v1186_v47  ;;  %v1799_v53 = vmul.f32 -1.442695, %v1065_v48  ;;  %v1067_v54 = vadd.f32 %v1010_v38, %v914_v49  ;;  %v3137_v35 = vunpack.c.h.bf16 %v2581_v16  ;;  %v2789_v37 = vpop.f32.mrb[23].mxu0 }
 0x17c   : > { %v2773_v56 = vpop.eup %2038  ;;  %v1509_v58 = vsub.f32 1.0, %v2768_v52  ;;  %2058 = vrcp.f32 %v1187_v50  ;;  %v1800_v59 = vmul.f32 -1.442695, %v1066_v30  ;;  %v3136_v14 = vunpack.c.h.bf16 %v2584_v17 }
 0x17d   : > { %v2779_v1 = vpop.eup %2040  ;;  %2060 = vpow2.f32 %v1798_v51  ;;  %v1801_v60 = vmul.f32 -1.442695, %v1067_v54  ;;  %v643_v4 = vpop.f32.mrb[16].mxu1  ;;  %v1510_v13 = vsub.f32 1.0, %v2773_v56 }
 0x17e   : > { %v2785_v18 = vpop.eup %2042  ;;  %v1511_v32 = vsub.f32 1.0, %v2779_v1  ;;  %2062 = vpow2.f32 %v1799_v53  ;;  %v918_v34 = vadd.f32 %v2752_v62, %v643_v4  ;;  %v645_v36 = vpop.f32.mrb[17].mxu1  ;;  %v2793_v38 = vmul.f32 %v1509_v58, %v3134_v46 }
 0x17f   : > { %v2045_v41 = vpop.eup %2044  ;;  %2064 = vpow2.f32 %v1800_v59  ;;  %v920_v42 = vadd.f32 %v2754_v2, %v645_v36  ;;  %v647_v43 = vpop.f32.mrb[18].mxu1  ;;  %v1512_v27 = vsub.f32 1.0, %v2785_v18  ;;  %v2799_v44 = vmul.f32 %v1510_v13, %v3129_v3 }
 0x180   : > { %v2047_v45 = vpop.eup %2046  ;;  %v1188_v62 = vadd.f32 1.0, %v2045_v41  ;;  %2066 = vpow2.f32 %v1801_v60  ;;  %v1068_v47 = vadd.f32 %v2730_v15, %v918_v34  ;;  %v922_v48 = vadd.f32 %v2758_v8, %v647_v43  ;;  %v649_v49 = vpop.f32.mrb[19].mxu1 }
 0x181   : > { %v2049_v50 = vpop.eup %2048  ;;  %v1189_v51 = vadd.f32 1.0, %v2047_v45  ;;  %v1069_v30 = vadd.f32 %v2730_v15, %v920_v42  ;;  %v924_v2 = vadd.f32 %v2762_v24, %v649_v49  ;;  %v2807_v53 = vmul.f32 %v1512_v27, %v3128_v63  ;;  %v2813_v15 = vpop.f32.mrb[24].mxu0 }
 0x182   : > { %v2051_v54 = vpop.eup %2050  ;;  %2068 = vrcp.f32 %v1188_v62  ;;  %v1190_v58 = vadd.f32 1.0, %v2049_v50  ;;  %v1802_v59 = vmul.f32 -1.442695, %v1068_v47  ;;  %v1070_v60 = vadd.f32 %v2734_v22, %v922_v48  ;;  %v2817_v41 = vpop.f32.mrb[25].mxu0 }
 0x183   : > { %v2810_v4 = vpop.eup %2052  ;;  %2070 = vrcp.f32 %v1189_v51  ;;  %v1191_v8 = vadd.f32 1.0, %v2051_v54  ;;  %v1803_v13 = vmul.f32 -1.442695, %v1069_v30  ;;  %v1071_v34 = vadd.f32 %v2734_v22, %v924_v2  ;;  %v2826_v22 = vpop.f32.mrb[26].mxu0 }
 0x184   : > { %v2815_v24 = vpop.eup %2054  ;;  %2072 = vrcp.f32 %v1190_v58  ;;  %v1804_v36 = vmul.f32 -1.442695, %v1070_v60  ;;  %v1513_v42 = vsub.f32 1.0, %v2810_v4  ;;  %v2822_v43 = vmul.f32 %v1511_v32, %v3133_v57  ;;  %v2833_v30 = vpop.f32.mrb[27].mxu0 }
 0x185   : > { %v2824_v27 = vpop.eup %2056  ;;  %2074 = vrcp.f32 %v1191_v8  ;;  %v1805_v45 = vmul.f32 -1.442695, %v1071_v34  ;;  %v653_v62 = vpop.f32.mrb[20].mxu1  ;;  %v1514_v47 = vsub.f32 1.0, %v2815_v24  ;;  %v3139_v48 = vunpack.c.l.bf16 %v2590_v20 }
 0x186   : > { %v2830_v49 = vpop.eup %2058  ;;  %2076 = vpow2.f32 %v1802_v59  ;;  %v928_v50 = vadd.f32 %v2770_v55, %v653_v62  ;;  %v655_v51 = vpop.f32.mrb[21].mxu1  ;;  %v1515_v32 = vsub.f32 1.0, %v2824_v27  ;;  %v2838_v2 = vmul.f32 %v1513_v42, %v3127_v10 }
 0x187   : > { %v2061_v54 = vpop.eup %2060  ;;  %2078 = vpow2.f32 %v1803_v13  ;;  %v930_v58 = vadd.f32 %v2776_v39, %v655_v51  ;;  %v657_v60 = vpop.f32.mrb[22].mxu1  ;;  %v1516_v8 = vsub.f32 1.0, %v2830_v49  ;;  %v2844_v59 = vmul.f32 %v1514_v47, %v3130_v9 }
 0x188   : > { %v2063_v55 = vpop.eup %2062  ;;  %v1192_v34 = vadd.f32 1.0, %v2061_v54  ;;  %2080 = vpow2.f32 %v1804_v36  ;;  %v1072_v62 = vadd.f32 %v2732_v19, %v928_v50  ;;  %v932_v0 = vadd.f32 %v2781_v5, %v657_v60  ;;  %v659_v42 = vpop.f32.mrb[23].mxu1 }
 0x189   : > { %v2065_v10 = vpop.eup %2064  ;;  %v1193_v63 = vadd.f32 1.0, %v2063_v55  ;;  %2082 = vpow2.f32 %v1805_v45  ;;  %v1073_v39 = vadd.f32 %v2732_v19, %v930_v58  ;;  %v934_v13 = vadd.f32 %v2789_v37, %v659_v42  ;;  %v947_v5 = vpop.f32.mrb[28].mxu0 }
 0x18a   : > { %v2067_v51 = vpop.eup %2066  ;;  %2084 = vrcp.f32 %v1192_v34  ;;  %v1194_v3 = vadd.f32 1.0, %v2065_v10  ;;  %v1806_v47 = vmul.f32 -1.442695, %v1072_v62  ;;  %v1074_v9 = vadd.f32 %v2737_v23, %v932_v0  ;;  %v2854_v55 = vpop.f32.mrb[29].mxu0 }
 0x18b   : > { %2086 = vrcp.f32 %v1193_v63  ;;  %v1195_v36 = vadd.f32 1.0, %v2067_v51  ;;  %v1807_v54 = vmul.f32 -1.442695, %v1073_v39  ;;  %v1075_v50 = vadd.f32 %v2737_v23, %v934_v13  ;;  %v2866_v37 = vpop.f32.mrb[30].mxu0 }
 0x18c   : > { %v2852_v60 = vpop.eup %2068  ;;  %2088 = vrcp.f32 %v1194_v3  ;;  %v1808_v45 = vmul.f32 -1.442695, %v1074_v9  ;;  %v2858_v19 = vmul.f32 %v1516_v8, %v3131_v28  ;;  %v2862_v10 = vmul.f32 %v1515_v32, %v3132_v29  ;;  %v2873_v62 = vpop.f32.mrb[31].mxu0 }
 0x18d   : > { %v2864_v0 = vpop.eup %2070  ;;  %2090 = vrcp.f32 %v1195_v36  ;;  %v1809_v63 = vmul.f32 -1.442695, %v1075_v50  ;;  %v663_v23 = vpop.f32.mrb[24].mxu1  ;;  %v1517_v3 = vsub.f32 1.0, %v2852_v60  ;;  %v1289_v9 = vunpack.c.h.bf16 %v2590_v20 }
 0x18e   : > { %v2870_v58 = vpop.eup %2072  ;;  %2092 = vpow2.f32 %v1806_v47  ;;  %v938_v8 = vadd.f32 %v2813_v15, %v663_v23  ;;  %v665_v34 = vpop.f32.mrb[25].mxu1  ;;  %v1518_v32 = vsub.f32 1.0, %v2864_v0 }
 0x18f   : > { %v2877_v39 = vpop.eup %2074  ;;  %2094 = vpow2.f32 %v1807_v54  ;;  %v940_v13 = vadd.f32 %v2817_v41, %v665_v34  ;;  %v667_v51 = vpop.f32.mrb[26].mxu1  ;;  %v1519_v36 = vsub.f32 1.0, %v2870_v58  ;;  %v2883_v47 = vmul.f32 %v1517_v3, %v3135_v40 }
 0x190   : > { %v2077_v15 = vpop.eup %2076  ;;  %2096 = vpow2.f32 %v1808_v45  ;;  %v1076_v50 = vadd.f32 %v2739_v25, %v938_v8  ;;  %v942_v23 = vadd.f32 %v2826_v22, %v667_v51  ;;  %v669_v28 = vpop.f32.mrb[27].mxu1  ;;  %v1520_v29 = vsub.f32 1.0, %v2877_v39 }
 0x191   : > { %v2079_v57 = vpop.eup %2078  ;;  %v1196_v54 = vadd.f32 1.0, %v2077_v15  ;;  %2098 = vpow2.f32 %v1809_v63  ;;  %v1077_v41 = vadd.f32 %v2739_v25, %v940_v13  ;;  %v944_v34 = vadd.f32 %v2833_v30, %v669_v28 }
 0x192   : > { %v2081_v46 = vpop.eup %2080  ;;  %v1197_v42 = vadd.f32 1.0, %v2079_v57  ;;  %v1078_v3 = vadd.f32 %v2742_v26, %v942_v23  ;;  %v2893_v45 = vmul.f32 %v1518_v32, %v3137_v35  ;;  %v1810_v40 = vmul.f32 -1.442695, %v1076_v50 }
 0x193   : > { %v2083_v8 = vpop.eup %2082  ;;  %2100 = vrcp.f32 %v1196_v54  ;;  %v1198_v51 = vadd.f32 1.0, %v2081_v46  ;;  %v1079_v63 = vadd.f32 %v2742_v26, %v944_v34  ;;  %v1811_v28 = vmul.f32 -1.442695, %v1077_v41 }
 0x194   : > { %v2897_v15 = vpop.eup %2084  ;;  %2102 = vrcp.f32 %v1197_v42  ;;  %v1199_v25 = vadd.f32 1.0, %v2083_v8  ;;  %v2901_v57 = vmul.f32 %v1520_v29, %v3136_v14  ;;  %v1812_v32 = vmul.f32 -1.442695, %v1078_v3 }
 0x195   : > { %v2903_v30 = vpop.eup %2086  ;;  %2104 = vrcp.f32 %v1198_v51  ;;  %v673_v13 = vpop.f32.mrb[28].mxu1  ;;  %v2907_v46 = vmul.f32 %v1519_v36, %v3138_v61  ;;  %v1521_v26 = vsub.f32 1.0, %v2897_v15  ;;  %v1813_v42 = vmul.f32 -1.442695, %v1079_v63 }
 0x196   : > { %v2910_v50 = vpop.eup %2088  ;;  %2106 = vrcp.f32 %v1199_v25  ;;  %v948_v23 = vadd.f32 %v947_v5, %v673_v13  ;;  %v675_v54 = vpop.f32.mrb[29].mxu1  ;;  %v1522_v29 = vsub.f32 1.0, %v2903_v30 }
 0x197   : > { %v2913_v41 = vpop.eup %2090  ;;  %2108 = vpow2.f32 %v1810_v40  ;;  %v950_v34 = vadd.f32 %v2854_v55, %v675_v54  ;;  %v677_v3 = vpop.f32.mrb[30].mxu1  ;;  %v1523_v8 = vsub.f32 1.0, %v2910_v50  ;;  %v2919_v36 = vmul.f32 %v1521_v26, %v3139_v48 }
 0x198   : > { %v2093_v51 = vpop.eup %2092  ;;  %2110 = vpow2.f32 %v1811_v28  ;;  %v1080_v63 = vadd.f32 %v2744_v31, %v948_v23  ;;  %v952_v5 = vadd.f32 %v2866_v37, %v677_v3  ;;  %v679_v25 = vpop.f32.mrb[31].mxu1  ;;  %v1524_v13 = vsub.f32 1.0, %v2913_v41 }
 0x199   : > { %v2095_v14 = vpop.eup %2094  ;;  %v1200_v40 = vadd.f32 1.0, %v2093_v51  ;;  %2112 = vpow2.f32 %v1812_v32  ;;  %v1081_v55 = vadd.f32 %v2744_v31, %v950_v34  ;;  %v954_v54 = vadd.f32 %v2873_v62, %v679_v25 }
 0x19a   : > { %v2097_v35 = vpop.eup %2096  ;;  %v1201_v61 = vadd.f32 1.0, %v2095_v14  ;;  %2114 = vpow2.f32 %v1813_v42  ;;  %v1082_v26 = vadd.f32 %v2746_v33, %v952_v5  ;;  %v1814_v48 = vmul.f32 -1.442695, %v1080_v63 }
 0x19b   : > { %v2099_v28 = vpop.eup %2098  ;;  %2116 = vrcp.f32 %v1200_v40  ;;  %v1202_v23 = vadd.f32 1.0, %v2097_v35  ;;  %v1083_v37 = vadd.f32 %v2746_v33, %v954_v54  ;;  %v1815_v22 = vmul.f32 -1.442695, %v1081_v55 }
 0x19c   : > { %2118 = vrcp.f32 %v1201_v61  ;;  %v1203_v3 = vadd.f32 1.0, %v2099_v28  ;;  %v2930_v32 = vmul.f32 %v1522_v29, %v1289_v9  ;;  %v1816_v62 = vmul.f32 -1.442695, %v1082_v26 }
 0x19d   : > { %v2101_v31 = vpop.eup %2100  ;;  %2120 = vrcp.f32 %v1202_v23  ;;  %v3155_v14 = vunpack.c.h.bf16 %v2593_v21  ;;  %v3157_v34 = vunpack.c.l.bf16 %v2593_v21  ;;  %v1817_v33 = vmul.f32 -1.442695, %v1083_v37 }
 0x19e   : > { %v2103_v51 = vpop.eup %2102  ;;  %2122 = vrcp.f32 %v1203_v3  ;;  %v3159_v29 = vunpack.c.l.bf16 %v2559_v6  ;;  %v3160_v25 = vunpack.c.l.bf16 %v2562_v7 }
 0x19f   : > { %v2934_v42 = vmul.f32 %v1524_v13, %v3155_v14  ;;  %v2938_v35 = vmul.f32 %v1523_v8, %v3157_v34  ;;  %v2105_v61 = vpop.eup %2104  ;;  %2124 = vpow2.f32 %v1814_v48  ;;  %v3161_v13 = vunpack.c.h.bf16 %v2559_v6 }
 0x1a0   : > { %v2107_v63 = vpop.eup %2106  ;;  %2126 = vpow2.f32 %v1815_v22  ;;  %v1292_v5 = vmul.f32 %v2101_v31, %v3159_v29  ;;  %v1294_v40 = vmul.f32 %v2105_v61, %v3160_v25  ;;  %v3162_v8 = vunpack.c.h.bf16 %v2562_v7 }
 0x1a1   : > { %3156 = vst [vmem:[#allocation11_spill] sm:$0xff] %v2934_v42  ;;  %3158 = vst [vmem:[#allocation12_spill] sm:$0xff] %v2938_v35  ;;  %v2109_v55 = vpop.eup %2108  ;;  %2128 = vpow2.f32 %v1816_v62  ;;  %v1293_v54 = vmul.f32 %v2103_v51, %v3161_v13  ;;  %v3163_v51 = vunpack.c.l.bf16 %v2570_v11  ;;  %v3165_v25 = vunpack.c.h.bf16 %v2570_v11 }
 0x1a2   : > { %v1295_v26 = vmul.f32 %v2107_v63, %v3162_v8  ;;  %v2111_v28 = vpop.eup %2110  ;;  %v1204_v23 = vadd.f32 1.0, %v2109_v55  ;;  %2130 = vpow2.f32 %v1817_v33  ;;  %v1308_v48 = vpack.c.bf16 %v1294_v40, %v1292_v5 }
 0x1a3   : > { %v2113_v37 = vpop.eup %2112  ;;  %v1205_v22 = vadd.f32 1.0, %v2111_v28  ;;  %v3164_v63 = vunpack.c.l.bf16 %v2573_v12  ;;  %v3166_v55 = vunpack.c.h.bf16 %v2573_v12 }
 0x1a4   : > { %v1309_v3 = vpack.c.bf16 %v1295_v26, %v1293_v54  ;;  %v2115_v14 = vpop.eup %2114  ;;  %2132 = vrcp.f32 %v1204_v23  ;;  %v1206_v31 = vadd.f32 1.0, %v2113_v37 }
 0x1a5   : > { %v2117_v34 = vpop.eup %2116  ;;  %2134 = vrcp.f32 %v1205_v22  ;;  %v1207_v61 = vadd.f32 1.0, %v2115_v14 }
 0x1a6   : > { %1356 = vmatprep.subr.bf16.mxu0 %v1309_v3  ;;  %v2119_v62 = vpop.eup %2118  ;;  %2136 = vrcp.f32 %v1206_v31  ;;  %v1296_v33 = vmul.f32 %v2117_v34, %v3163_v51  ;;  %v3167_v34 = vunpack.c.l.bf16 %v2581_v16 }
 0x1a7   : > { %1357 = vmatpush1.bf16.msra.mxu0 %v1308_v48  ;;  %v2121_v6 = vpop.eup %2120  ;;  %2138 = vrcp.f32 %v1207_v61  ;;  %v1297_v40 = vmul.f32 %v2119_v62, %v3165_v25  ;;  %v3168_v62 = vunpack.c.l.bf16 %v2584_v17 }
 0x1a8   : > { %v2123_v7 = vpop.eup %2122  ;;  %v1298_v29 = vmul.f32 %v2121_v6, %v3164_v63 }
 0x1a9   : > { %v2125_v5 = vpop.eup %2124  ;;  %v1299_v13 = vmul.f32 %v2123_v7, %v3166_v55  ;;  %v3169_v7 = vunpack.c.h.bf16 %v2581_v16 }
 0x1aa   : > { %v2127_v54 = vpop.eup %2126  ;;  %v1208_v8 = vadd.f32 1.0, %v2125_v5  ;;  %v1310_v26 = vpack.c.bf16 %v1298_v29, %v1296_v33  ;;  %v3170_v33 = vunpack.c.h.bf16 %v2584_v17  ;;  %v3173_v17 = vunpack.c.h.bf16 %v2593_v21 }
 0x1ab   : > { %v2129_v28 = vpop.eup %2128  ;;  %v1209_v23 = vadd.f32 1.0, %v2127_v54  ;;  %v1311_v48 = vpack.c.bf16 %v1299_v13, %v1297_v40  ;;  %v3171_v54 = vunpack.c.l.bf16 %v2590_v20  ;;  %v2015_v20 = vld [vmem:[%s3117_s4 + $0x8] sm:$0xff]  }
 0x1ac   : > { %v2131_v37 = vpop.eup %2130  ;;  %2140 = vrcp.f32 %v1208_v8  ;;  %v1210_v22 = vadd.f32 1.0, %v2129_v28 }
 0x1ad   : > { %2142 = vrcp.f32 %v1209_v23  ;;  %v1211_v3 = vadd.f32 1.0, %v2131_v37  ;;  %1358 = vmatprep.subr.bf16.mxu0 %v1311_v48 }
 0x1ae   : > { %v2133_v14 = vpop.eup %2132  ;;  %2144 = vrcp.f32 %v1210_v22  ;;  %1359 = vmatpush1.bf16.msra.mxu0 %v1310_v26  ;;  %v3172_v26 = vunpack.c.l.bf16 %v2593_v21  ;;  %v2013_v22 = vld [vmem:[%s3117_s4] sm:$0xff]   ;;  %v2017_v21 = vld [vmem:[%s3117_s4 + $0x10] sm:$0xff]  }
 0x1af   : > { %v2135_v11 = vpop.eup %2134  ;;  %2146 = vrcp.f32 %v1211_v3  ;;  %v1300_v61 = vmul.f32 %v2133_v14, %v3167_v34  ;;  %v3174_v3 = vmov 0   ;;  %v683_v14 = vpop.f32.mrb[32].mxu1 }
 0x1b0   : > { %v2137_v31 = vpop.eup %2136  ;;  %v1301_v51 = vmul.f32 %v2135_v11, %v3169_v7  ;;  %v685_v11 = vpop.f32.mrb[33].mxu1 }
 0x1b1   : > { %v2139_v12 = vpop.eup %2138  ;;  %v1302_v6 = vmul.f32 %v2137_v31, %v3168_v62  ;;  %v687_v31 = vpop.f32.mrb[34].mxu1 }
 0x1b2   : > { %v1303_v63 = vmul.f32 %v2139_v12, %v3170_v33  ;;  %v689_v12 = vpop.f32.mrb[35].mxu1 }
 0x1b3   : > { %v1312_v29 = vpack.c.bf16 %v1302_v6, %v1300_v61  ;;  %v693_v34 = vpop.f32.mrb[36].mxu1 }
 0x1b4   : > { %v1313_v5 = vpack.c.bf16 %v1303_v63, %v1301_v51  ;;  %v695_v61 = vpop.f32.mrb[37].mxu1 }
 0x1b5   : > { %v697_v62 = vpop.f32.mrb[38].mxu1 }
 0x1b6   : > { %v2141_v25 = vpop.eup %2140  ;;  %1360 = vmatprep.subr.bf16.mxu0 %v1313_v5  ;;  %v699_v6 = vpop.f32.mrb[39].mxu1 }
 0x1b7   : > { %v2143_v40 = vpop.eup %2142  ;;  %1361 = vmatpush1.bf16.msra.mxu0 %v1312_v29  ;;  %v1304_v8 = vmul.f32 %v2141_v25, %v3171_v54  ;;  %v703_v7 = vpop.f32.mrb[40].mxu1 }
 0x1b8   : > { %v2145_v55 = vpop.eup %2144  ;;  %v1305_v16 = vmul.f32 %v2143_v40, %v1289_v9  ;;  %v2019_v9 = vld [vmem:[%s3117_s4 + $0x18] sm:$0xff]   ;;  %v705_v51 = vpop.f32.mrb[41].mxu1 }
 0x1b9   : > { %v2147_v13 = vpop.eup %2146  ;;  %v1306_v28 = vmul.f32 %v2145_v55, %v3172_v26  ;;  %v707_v33 = vpop.f32.mrb[42].mxu1 }
 0x1ba   : > { %v1307_v23 = vmul.f32 %v2147_v13, %v3173_v17  ;;  %v2991_v63 = vpop.f32.mrb[43].mxu1 }
 0x1bb   : > { %v1314_v48 = vpack.c.bf16 %v1306_v28, %v1304_v8  ;;  %v2993_v29 = vpop.f32.mrb[44].mxu1  ;;  %v1440_v8 = vpop.permute.xlu0 %1439 }
 0x1bc   : > { %v1315_v37 = vpack.c.bf16 %v1307_v23, %v1305_v16  ;;  %v2995_v5 = vpop.f32.mrb[45].mxu1 }
 0x1bd   : > { %v2997_v25 = vpop.f32.mrb[46].mxu1 }
 0x1be   : > { %1362 = vmatprep.subr.bf16.mxu0 %v1315_v37  ;;  %v2999_v40 = vpop.f32.mrb[47].mxu1 }
 0x1bf   : > { %1363 = vmatpush1.bf16.msra.mxu0 %v1314_v48  ;;  %v1445_v48 = vpop.permute.xlu1 %1444 }
 0x1c2   : > { %1822 = vmatmul.mubr.msk.bf16.vlgmr.msra.gmra.mrb[32].mxu0 %vm818_vm0, %v2013_v22 }
 0x1c3   : > { %1398 = vmatprep.mubr.bf16.mxu0 %v3174_v3 }
 0x1ca   : > { %1823 = vmatmul.mubr.msk.bf16.gmra.mrb[36].mxu0 %vm818_vm0, %v2015_v20 }
 0x1cb   : > { %1408 = vmatprep.mubr.bf16.mxu0 %v3174_v3 }
 0x1d2   : > { %1824 = vmatmul.mubr.msk.bf16.gmra.mrb[40].mxu0 %vm818_vm0, %v2017_v21 }
 0x1d3   : > { %1418 = vmatprep.mubr.bf16.mxu0 %v3174_v3 }
 0x1da   : > { %1825 = vmatmul.mubr.msk.bf16.gmra.mrb[44].mxu0 %vm818_vm0, %v2019_v9 }
 0x295   : > { %v1390_v55 = vpop.f32.mrb[32].mxu0 }
 0x296   : > { %v1391_v13 = vadd.f32 %v1390_v55, %v683_v14  ;;  %v1392_v54 = vpop.f32.mrb[33].mxu0  ;;  %v1450_v55 = vpop.permute.xlu0 %1449 }
 0x297   : > { %v1393_v26 = vadd.f32 %v1392_v54, %v685_v11  ;;  %v1394_v28 = vpop.f32.mrb[34].mxu0 }
 0x298   : > { %v1477_v16 = vadd.f32 %v1440_v8, %v1391_v13  ;;  %v1395_v17 = vadd.f32 %v1394_v28, %v687_v31  ;;  %v1396_v23 = vpop.f32.mrb[35].mxu0  ;;  %v1455_v28 = vpop.permute.xlu1 %1454 }
 0x299   : > { %v1478_v37 = vadd.f32 %v1440_v8, %v1393_v26  ;;  %v1397_v22 = vadd.f32 %v1396_v23, %v689_v12 }
 0x29a   : > { %2148 = vtanh.f32 %v1477_v16  ;;  %v1479_v3 = vadd.f32 %v1445_v48, %v1395_v17 }
 0x29b   : > { %2150 = vtanh.f32 %v1478_v37  ;;  %v1480_v20 = vadd.f32 %v1445_v48, %v1397_v22 }
 0x29c   : > { %2152 = vtanh.f32 %v1479_v3 }
 0x29d   : > { %2154 = vtanh.f32 %v1480_v20  ;;  %v1400_v21 = vpop.f32.mrb[36].mxu0 }
 0x29e   : > { %v1401_v9 = vadd.f32 %v1400_v21, %v693_v34  ;;  %v1402_v14 = vpop.f32.mrb[37].mxu0 }
 0x29f   : > { %v1403_v42 = vadd.f32 %v1402_v14, %v695_v61  ;;  %v1404_v11 = vpop.f32.mrb[38].mxu0 }
 0x2a0   : > { %v1481_v54 = vadd.f32 %v1450_v55, %v1401_v9  ;;  %v1405_v13 = vadd.f32 %v1404_v11, %v697_v62  ;;  %v1406_v31 = vpop.f32.mrb[39].mxu0  ;;  %v1465_v11 = vpop.permute.xlu1 %1464 }
 0x2a1   : > { %v1482_v35 = vadd.f32 %v1450_v55, %v1403_v42  ;;  %v1407_v8 = vadd.f32 %v1406_v31, %v699_v6  ;;  %v1460_v42 = vpop.permute.xlu0 %1459 }
 0x2a2   : > { %2156 = vtanh.f32 %v1481_v54  ;;  %v1483_v12 = vadd.f32 %v1455_v28, %v1405_v13 }
 0x2a3   : > { %2158 = vtanh.f32 %v1482_v35  ;;  %v1484_v26 = vadd.f32 %v1455_v28, %v1407_v8 }
 0x2a4   : > { %v2149_v16 = vpop.eup %2148  ;;  %2160 = vtanh.f32 %v1483_v12 }
 0x2a5   : > { %v2151_v17 = vpop.eup %2150  ;;  %v1541_v34 = vmul.f32 %v2149_v16, %v2768_v52  ;;  %2162 = vtanh.f32 %v1484_v26  ;;  %v1410_v23 = vpop.f32.mrb[40].mxu0 }
 0x2a6   : > { %v2153_v61 = vpop.eup %2152  ;;  %v1542_v48 = vmul.f32 %v2151_v17, %v2773_v56  ;;  %v1411_v62 = vadd.f32 %v1410_v23, %v703_v7  ;;  %v1412_v37 = vpop.f32.mrb[41].mxu0 }
 0x2a7   : > { %v2155_v22 = vpop.eup %2154  ;;  %v1557_v6 = vadd.f32 %v1541_v34, %v2793_v38  ;;  %v1543_v3 = vmul.f32 %v2153_v61, %v2779_v1  ;;  %v1413_v35 = vadd.f32 %v1412_v37, %v705_v51  ;;  %v1414_v20 = vpop.f32.mrb[42].mxu0 }
 0x2a8   : > { %v1558_v21 = vadd.f32 %v1542_v48, %v2799_v44  ;;  %v1544_v9 = vmul.f32 %v2155_v22, %v2785_v18  ;;  %v1485_v52 = vadd.f32 %v1460_v42, %v1411_v62  ;;  %v1415_v14 = vadd.f32 %v1414_v20, %v707_v33  ;;  %v1416_v55 = vpop.f32.mrb[43].mxu0  ;;  %v1470_v8 = vpop.permute.xlu0 %1469 }
 0x2a9   : > { %1573 = vst [vmem:[%s3008_s3] sm:$0xff] %v1557_v6  ;;  %v1559_v56 = vadd.f32 %v1543_v3, %v2822_v43  ;;  %v1486_v1 = vadd.f32 %v1460_v42, %v1413_v35  ;;  %v1417_v38 = vadd.f32 %v1416_v55, %v2991_v63  ;;  %v1475_v61 = vpop.permute.xlu1 %1474 }
 0x2aa   : > { %1574 = vst [vmem:[%s3008_s3 + $0x8] sm:$0xff] %v1558_v21  ;;  %v1560_v44 = vadd.f32 %v1544_v9, %v2807_v53  ;;  %2164 = vtanh.f32 %v1485_v52  ;;  %v1487_v18 = vadd.f32 %v1465_v11, %v1415_v14 }
 0x2ab   : > { %1575 = vst [vmem:[%s3008_s3 + $0x10] sm:$0xff] %v1559_v56  ;;  %2166 = vtanh.f32 %v1486_v1  ;;  %v1488_v7 = vadd.f32 %v1465_v11, %v1417_v38 }
 0x2ac   : > { %v2157_v51 = vpop.eup %2156  ;;  %1576 = vst [vmem:[%s3008_s3 + $0x18] sm:$0xff] %v1560_v44  ;;  %2168 = vtanh.f32 %v1487_v18 }
 0x2ad   : > { %v2159_v33 = vpop.eup %2158  ;;  %v1545_v54 = vmul.f32 %v2157_v51, %v2810_v4  ;;  %2170 = vtanh.f32 %v1488_v7  ;;  %v1420_v13 = vpop.f32.mrb[44].mxu0 }
 0x2ae   : > { %v2161_v43 = vpop.eup %2160  ;;  %v1546_v63 = vmul.f32 %v2159_v33, %v2815_v24  ;;  %v1421_v31 = vadd.f32 %v1420_v13, %v2993_v29  ;;  %v1422_v53 = vpop.f32.mrb[45].mxu0 }
 0x2af   : > { %v2163_v28 = vpop.eup %2162  ;;  %v1561_v12 = vadd.f32 %v1545_v54, %v2838_v2  ;;  %v1547_v26 = vmul.f32 %v2161_v43, %v2824_v27  ;;  %v1423_v16 = vadd.f32 %v1422_v53, %v2995_v5  ;;  %v1424_v4 = vpop.f32.mrb[46].mxu0 }
 0x2b0   : > { %v1562_v17 = vadd.f32 %v1546_v63, %v2844_v59  ;;  %v1548_v34 = vmul.f32 %v2163_v28, %v2830_v49  ;;  %v1489_v23 = vadd.f32 %v1470_v8, %v1421_v31  ;;  %v1425_v24 = vadd.f32 %v1424_v4, %v2997_v25  ;;  %v1426_v29 = vpop.f32.mrb[47].mxu0 }
 0x2b1   : > { %1577 = vst [vmem:[%s3008_s3 + $0x20] sm:$0xff] %v1561_v12  ;;  %v1563_v48 = vadd.f32 %v1547_v26, %v2862_v10  ;;  %v1490_v2 = vadd.f32 %v1470_v8, %v1423_v16  ;;  %v1427_v27 = vadd.f32 %v1426_v29, %v2999_v40 }
 0x2b2   : > { %1578 = vst [vmem:[%s3008_s3 + $0x28] sm:$0xff] %v1562_v17  ;;  %v1564_v5 = vadd.f32 %v1548_v34, %v2858_v19  ;;  %2172 = vtanh.f32 %v1489_v23  ;;  %v1491_v62 = vadd.f32 %v1475_v61, %v1425_v24 }
 0x2b3   : > { %1579 = vst [vmem:[%s3008_s3 + $0x30] sm:$0xff] %v1563_v48  ;;  %2174 = vtanh.f32 %v1490_v2  ;;  %v1492_v49 = vadd.f32 %v1475_v61, %v1427_v27 }
 0x2b4   : > { %v2165_v59 = vpop.eup %2164  ;;  %1580 = vst [vmem:[%s3008_s3 + $0x38] sm:$0xff] %v1564_v5  ;;  %2176 = vtanh.f32 %v1491_v62 }
 0x2b5   : > { %v2167_v25 = vpop.eup %2166  ;;  %v1549_v10 = vmul.f32 %v2165_v59, %v2852_v60  ;;  %2178 = vtanh.f32 %v1492_v49 }
 0x2b6   : > { %v2169_v40 = vpop.eup %2168  ;;  %v1550_v37 = vmul.f32 %v2167_v25, %v2864_v0 }
 0x2b7   : > { %v2171_v19 = vpop.eup %2170  ;;  %v1565_v22 = vadd.f32 %v1549_v10, %v2883_v47  ;;  %v1551_v42 = vmul.f32 %v2169_v40, %v2870_v58 }
 0x2b8   : > { %v1566_v6 = vadd.f32 %v1550_v37, %v2893_v45  ;;  %v1552_v3 = vmul.f32 %v2171_v19, %v2877_v39 }
 0x2b9   : > { %1581 = vst [vmem:[%s3008_s3 + $0x40] sm:$0xff] %v1565_v22  ;;  %v1567_v35 = vadd.f32 %v1551_v42, %v2907_v46 }
 0x2ba   : > { %1582 = vst [vmem:[%s3008_s3 + $0x48] sm:$0xff] %v1566_v6  ;;  %v1568_v60 = vadd.f32 %v1552_v3, %v2901_v57 }
 0x2bb   : > { %1583 = vst [vmem:[%s3008_s3 + $0x50] sm:$0xff] %v1567_v35 }
 0x2bc   : > { %v2173_v0 = vpop.eup %2172  ;;  %1584 = vst [vmem:[%s3008_s3 + $0x58] sm:$0xff] %v1568_v60 }
 0x2bd   : > { %v2175_v20 = vpop.eup %2174  ;;  %v1553_v47 = vmul.f32 %v2173_v0, %v2897_v15  ;;  %v3175_v15 = vld [vmem:[#allocation12_spill] sm:$0xff] }
 0x2be   : > { %v2177_v58 = vpop.eup %2176  ;;  %v1554_v45 = vmul.f32 %v2175_v20, %v2903_v30  ;;  %v3176_v30 = vld [vmem:[#allocation11_spill] sm:$0xff] }
 0x2bf   : > { %v2179_v39 = vpop.eup %2178  ;;  %v1569_v46 = vadd.f32 %v1553_v47, %v2919_v36  ;;  %v1555_v57 = vmul.f32 %v2177_v58, %v2910_v50 }
 0x2c0   : > { %v1570_v21 = vadd.f32 %v1554_v45, %v2930_v32  ;;  %v1556_v9 = vmul.f32 %v2179_v39, %v2913_v41 }
 0x2c1   : > { %1585 = vst [vmem:[%s3008_s3 + $0x60] sm:$0xff] %v1569_v46  ;;  %v1571_v52 = vadd.f32 %v1555_v57, %v3175_v15 }
 0x2c2   : > { %1586 = vst [vmem:[%s3008_s3 + $0x68] sm:$0xff] %v1570_v21  ;;  %v1572_v50 = vadd.f32 %v1556_v9, %v3176_v30 }
 0x2c3   : > { %1587 = vst [vmem:[%s3008_s3 + $0x70] sm:$0xff] %v1571_v52 }
 0x2c4   : > { %1588 = vst [vmem:[%s3008_s3 + $0x78] sm:$0xff] %v1572_v50 }
 0x2c5   : > { %2251 = shalt.err (!%p2248_p9)
}
 0x2c6   : > { %s2252_s15 = scalar_lea.hbm %s3058_s16, 2048  ;;  %s2256_s3 = scalar_lea.hbm %s3120_s7, 4096 }
 0x2c7   : > { %p2253_p1 = scmp.ne.s32.totalorder %s3058_s16, %s2252_s15  ;;  %p2257_p7 = scmp.lt.u32.totalorder %s3058_s16, %s3120_s7 }
 0x2c8   : > { %p2258_p13 = scmp.lt.u32.totalorder %s2256_s3, %s2252_s15  ;;  %p2260_p6 = scmp.lt.u32.totalorder %s2252_s15, %s3058_s16 }
 0x2c9   : > { %p2254_p2 = pnand %p2253_p1, %p2472_p10 }
 0x2ca   : > { %p2259_p4 = por %p2258_p13, %p2257_p7 }
 0x2cb   : > { %p2255_p3 = pneg %p2254_p2 }
 0x2cc   : > { %p2261_p8 = por %p2260_p6, %p2259_p4 }
 0x2ce   : > { %p2262_p12 = pnand %p2261_p8, %p2255_p3 }
 0x2d0   : > { %2265 = shalt.err (!%p2262_p12)
}
 0x2d1   : > { %s2334_s9 = smov 256   ;;  %s2335_s21 = smov 16  }
 0x2d2   : > { %1888 = dma.vmem_to_hbm [thread:$0]  (%p2472_p10), %s3060_s13, 2048, %s3058_s16, %s1590_s27, %s2334_s9, %s2334_s9, %s2335_s21  }
 0x2d3 PF: > { %s1620_s19 = sand.u32 1, %s2304_s24   ;;  %p3177_p11 = scmp.ne.s32.totalorder %s3144_s12, 0 }
 0x2d4   : > { %p3178_p0 = scmp.ge.s32.totalorder %s2324_s29, 2  ;;  %s1621_s18 = scalar_lea.sflag [#allocation4], %s1620_s19 }
 0x2d6   : > { %p1899_p5 = pnand %p3178_p0, %p3177_p11 }
 0x2d8   : > { %2299 = dma.done.wait (!%p1899_p5), %s1621_s18, 2048  }
 0x2d9   : > { %2301 = vsyncadd (!%p1899_p5), %s1621_s18, 4294965248  ;;  %s24_s29 = sadd.s32 1, %s2324_s29   ;;  %s3179_s24 = smov %s2308_s25 }
 0x2da   : > { %p21_p9 = scmp.ge.s32.totalorder %s24_s29, 4   ;;  %s3180_s25 = smov %s2312_s26 }
 0x2db   : > { %s3181_s26 = smov %s2481_s8  ;;  %s3182_s27 = smov %s2320_s28 }
 0x2dc   : > { %s3183_s28 = smov %s3185_s17  ;;  %23 = sbr.rel (!%p21_p9) target bundleno = 9 (0x9), region = 100 }
 0x2e3   :  { %1626 = vsyncpa [#allocation3], 1 }
 0x2e4   :  { %1628 = vsyncpa [#allocation3 + $0x1], 1 }
 0x2e5   :  { %1629 = vsyncpa [#allocation6], 1 }
 0x2e6   :  { %1630 = vsyncpa [#allocation4], 1 }
 0x2e7   :  { %1632 = vsyncpa [#allocation4 + $0x1], 1 }

</bundles_post_ra>
